<compile_context>
chip_gen: v7x
topology: tpu7x:2x2x1
jax: 0.10.0
libtpu: 0.0.40
codegen_flags: <defaults>
</compile_context>

<pallas_src>
import jax
import jax.numpy as jnp
from jax.experimental import pallas as pl
from jax.experimental.pallas import tpu as pltpu

NEURONS = 50
HIDDEN_LAYERS = 6                    # number of Linear(50,50) layers
NUM_LINEAR = HIDDEN_LAYERS + 2       # 8 linear layers total
NUM_STACKED = NUM_LINEAR - 1         # layers 1..7 stored as stacked (PAD,PAD) mats
PAD = 128                            # lane-padded feature width
IN_PAD = 8                           # padded input feature width (4 real columns)
TILE_N = 256                         # batch rows per grid step


def _mlp_kernel(x_ref, w0_ref, w_ref, b_ref, o_ref):
    """x_ref : (TILE_N, IN_PAD) f32   -- cols 0..3 = [x, y, z, t]
       w0_ref: (IN_PAD, PAD)    f32   -- first Linear weight (transposed), rows 4.. zero
       w_ref : (NUM_STACKED, PAD, PAD) bf16 -- hidden + output weights (transposed)
       b_ref : (NUM_LINEAR, PAD) f32  -- all biases (row 0 = first layer)
       o_ref : (TILE_N, PAD) f32      -- cols 0..3 hold the raw MLP output
    """
    xin = x_ref[...]
    w0 = w0_ref[...]

    # First layer (fan_in = 4): 4 rank-1 broadcast MACs on the VPU beat a K=4
    # MXU matmul and let the input stay 8 lanes wide in HBM.
    h = (b_ref[0][None, :]
         + xin[:, 0:1] * w0[0:1, :]
         + xin[:, 1:2] * w0[1:2, :]
         + xin[:, 2:3] * w0[2:3, :]
         + xin[:, 3:4] * w0[3:4, :])
    h = jnp.tanh(h)

    # 6 hidden Linear+Tanh layers: bf16 MXU operands, f32 accumulate,
    # f32 bias-add / tanh.  Static Python loop -> unrolled at trace time.
    for layer in range(HIDDEN_LAYERS):
        h = jnp.tanh(
            jnp.dot(h.astype(jnp.bfloat16), w_ref[layer],
                    preferred_element_type=jnp.float32)
            + b_ref[layer + 1][None, :])

    # Final Linear(50,4), no activation.  Head transforms live in the wrapper.
    o_ref[...] = (
        jnp.dot(h.astype(jnp.bfloat16), w_ref[NUM_STACKED - 1],
                preferred_element_type=jnp.float32)
        + b_ref[NUM_LINEAR - 1][None, :])


@jax.jit
def porosity_pinn_forward(x, y, z, t, w0, w_stack, b_stack):
    """x, y, z, t: (N, 1) float32.  Returns 4 arrays of shape (N, 1)."""
    n = x.shape[0]
    n_pad = pl.cdiv(n, TILE_N) * TILE_N          # pad batch to a tile multiple
    grid_n = n_pad // TILE_N

    inputs = jnp.concatenate([x, y, z, t], axis=1).astype(jnp.float32)   # (N, 4)
    inputs_p = jnp.zeros((n_pad, IN_PAD), jnp.float32).at[:n, :4].set(inputs)

    out_p = pl.pallas_call(
        _mlp_kernel,
        out_shape=jax.ShapeDtypeStruct((n_pad, PAD), jnp.float32),
        grid_spec=pltpu.PrefetchScalarGridSpec(
            num_scalar_prefetch=0,
            grid=(grid_n,),
            in_specs=[
                pl.BlockSpec((TILE_N, IN_PAD), lambda i: (i, 0)),
                pl.BlockSpec(memory_space=pltpu.MemorySpace.VMEM),   # w0  (pinned)
                pl.BlockSpec(memory_space=pltpu.MemorySpace.VMEM),   # w_stack
                pl.BlockSpec(memory_space=pltpu.MemorySpace.VMEM),   # b_stack
            ],
            out_specs=pl.BlockSpec((TILE_N, PAD), lambda i: (i, 0)),
        ),
        compiler_params=pltpu.CompilerParams(
            dimension_semantics=("parallel",)),
    )(inputs_p, w0, w_stack, b_stack)

    # Per-column heads on the (N, 4) slice only (negligible XLA elementwise ops).
    raw = out_p[:n, :4]
    porosity = jax.nn.sigmoid(raw[:, 0:1]) * 0.5
    permeability = jnp.exp(raw[:, 1:2] - 10.0)
    mineral1 = jax.nn.sigmoid(raw[:, 2:3])
    mineral2 = jax.nn.sigmoid(raw[:, 3:4]) * 0.3
    return porosity, permeability, mineral1, mineral2


def init_params(key):
    """PyTorch-default-like init, zero-padded.  Weights stored transposed
    (in, out) so the kernel computes y = x @ W + b (== x @ weight.T + bias)."""
    dims = [4] + [NEURONS] * (HIDDEN_LAYERS + 1) + [4]      # len = NUM_LINEAR + 1
    w0 = jnp.zeros((IN_PAD, PAD), jnp.float32)
    w_stack = jnp.zeros((NUM_STACKED, PAD, PAD), jnp.float32)
    b_stack = jnp.zeros((NUM_LINEAR, PAD), jnp.float32)
    keys = jax.random.split(key, 2 * NUM_LINEAR)
    for l in range(NUM_LINEAR):
        fan_in, fan_out = dims[l], dims[l + 1]
        bound = 1.0 / (fan_in ** 0.5)
        w = jax.random.uniform(keys[2 * l], (fan_in, fan_out), jnp.float32,
                               minval=-bound, maxval=bound)
        b = jax.random.uniform(keys[2 * l + 1], (fan_out,), jnp.float32,
                               minval=-bound, maxval=bound)
        if l == 0:
            w0 = w0.at[:fan_in, :fan_out].set(w)
        else:
            w_stack = w_stack.at[l - 1, :fan_in, :fan_out].set(w)
        b_stack = b_stack.at[l, :fan_out].set(b)
    # bf16 MXU operands for the stacked layers; first layer / biases stay f32.
    return w0, w_stack.astype(jnp.bfloat16), b_stack


def _reference_forward(x, y, z, t, w0, w_stack, b_stack):
    """Pure-JAX reference mirroring the kernel math (bf16 dots, f32 accumulate)."""
    inp = jnp.concatenate([x, y, z, t], axis=1).astype(jnp.float32)
    h = (b_stack[0][None, :]
         + inp[:, 0:1] * w0[0:1, :]
         + inp[:, 1:2] * w0[1:2, :]
         + inp[:, 2:3] * w0[2:3, :]
         + inp[:, 3:4] * w0[3:4, :])
    h = jnp.tanh(h)
    for l in range(HIDDEN_LAYERS):
        h = jnp.tanh(
            jnp.dot(h.astype(jnp.bfloat16), w_stack[l],
                    preferred_element_type=jnp.float32)
            + b_stack[l + 1][None, :])
    out = (jnp.dot(h.astype(jnp.bfloat16), w_stack[NUM_STACKED - 1],
                   preferred_element_type=jnp.float32)
           + b_stack[NUM_LINEAR - 1][None, :])
    raw = out[:, :4]
    return (jax.nn.sigmoid(raw[:, 0:1]) * 0.5,
            jnp.exp(raw[:, 1:2] - 10.0),
            jax.nn.sigmoid(raw[:, 2:3]),
            jax.nn.sigmoid(raw[:, 3:4]) * 0.3)


# TODO(synk): compute_derivatives (autograd w.r.t. inputs) is not ported — it
# would be expressed with jax.grad/jvp around this forward, not inside the kernel.

if __name__ == "__main__":
    key = jax.random.PRNGKey(0)
    kw, kx = jax.random.split(key)
    w0, w_stack, b_stack = init_params(kw)

    N = 1000  # collocation points; deliberately NOT a multiple of TILE_N
    kx1, kx2, kx3, kx4 = jax.random.split(kx, 4)
    x = jax.random.uniform(kx1, (N, 1), jnp.float32)
    y = jax.random.uniform(kx2, (N, 1), jnp.float32)
    z = jax.random.uniform(kx3, (N, 1), jnp.float32)
    t = jax.random.uniform(kx4, (N, 1), jnp.float32)

    outs = porosity_pinn_forward(x, y, z, t, w0, w_stack, b_stack)
    outs = jax.block_until_ready(outs)

    refs = _reference_forward(x, y, z, t, w0, w_stack, b_stack)
    for got, want in zip(outs, refs):
        assert got.shape == want.shape == (N, 1)
        assert jnp.allclose(got, want, rtol=5e-3, atol=1e-6), (
            float(jnp.max(jnp.abs(got - want))))

    print("KERNEL_OK")
</pallas_src>

<mosaic_0001>
module attributes {stable_mosaic.version = 11 : i64} {
  func.func @_mlp_kernel(%arg0: i32, %arg1: memref<256x8xf32, #tpu.memory_space<vmem>>, %arg2: memref<8x128xf32, #tpu.memory_space<vmem>>, %arg3: memref<7x128x128xbf16, #tpu.memory_space<vmem>>, %arg4: memref<8x128xf32, #tpu.memory_space<vmem>>, %arg5: memref<256x128xf32, #tpu.memory_space<vmem>>) attributes {dimension_semantics = [#tpu.dimension_semantics<parallel>], iteration_bounds = array<i64: 4>, scalar_prefetch = 0 : i64, scratch_operands = 0 : i64, tpu.core_type = #tpu.core_type<tc>, window_params = [{transform_indices = @transform_0, window_bounds = array<i64: 256, 8>}, {pipeline_mode = #tpu.pipeline_mode<synchronous>, transform_indices = @transform_1, window_bounds = array<i64: 8, 128>}, {pipeline_mode = #tpu.pipeline_mode<synchronous>, transform_indices = @transform_2, window_bounds = array<i64: 7, 128, 128>}, {pipeline_mode = #tpu.pipeline_mode<synchronous>, transform_indices = @transform_3, window_bounds = array<i64: 8, 128>}, {transform_indices = @transform_4, window_bounds = array<i64: 256, 128>}]} {
    %c0 = arith.constant 0 : index
    %c0_0 = arith.constant 0 : index
    %0 = vector.load %arg1[%c0, %c0_0] : memref<256x8xf32, #tpu.memory_space<vmem>>, vector<256x8xf32>
    %c0_1 = arith.constant 0 : index
    %c0_2 = arith.constant 0 : index
    %1 = vector.load %arg2[%c0_1, %c0_2] : memref<8x128xf32, #tpu.memory_space<vmem>>, vector<8x128xf32>
    %c0_3 = arith.constant 0 : index
    %c0_4 = arith.constant 0 : index
    %2 = vector.load %arg4[%c0_3, %c0_4] : memref<8x128xf32, #tpu.memory_space<vmem>>, vector<1x128xf32>
    %3 = vector.shape_cast %2 : vector<1x128xf32> to vector<128xf32>
    %4 = vector.shape_cast %3 : vector<128xf32> to vector<1x128xf32>
    %5 = vector.extract_strided_slice %0 {offsets = [0, 0], sizes = [256, 1], strides = [1, 1]} : vector<256x8xf32> to vector<256x1xf32>
    %6 = vector.extract_strided_slice %1 {offsets = [0, 0], sizes = [1, 128], strides = [1, 1]} : vector<8x128xf32> to vector<1x128xf32>
    %7 = vector.broadcast %5 : vector<256x1xf32> to vector<256x128xf32>
    %8 = vector.broadcast %6 : vector<1x128xf32> to vector<256x128xf32>
    %9 = arith.mulf %7, %8 : vector<256x128xf32>
    %10 = vector.broadcast %4 : vector<1x128xf32> to vector<256x128xf32>
    %11 = arith.addf %10, %9 : vector<256x128xf32>
    %12 = vector.extract_strided_slice %0 {offsets = [0, 1], sizes = [256, 1], strides = [1, 1]} : vector<256x8xf32> to vector<256x1xf32>
    %13 = vector.extract_strided_slice %1 {offsets = [1, 0], sizes = [1, 128], strides = [1, 1]} : vector<8x128xf32> to vector<1x128xf32>
    %14 = vector.broadcast %12 : vector<256x1xf32> to vector<256x128xf32>
    %15 = vector.broadcast %13 : vector<1x128xf32> to vector<256x128xf32>
    %16 = arith.mulf %14, %15 : vector<256x128xf32>
    %17 = arith.addf %11, %16 : vector<256x128xf32>
    %18 = vector.extract_strided_slice %0 {offsets = [0, 2], sizes = [256, 1], strides = [1, 1]} : vector<256x8xf32> to vector<256x1xf32>
    %19 = vector.extract_strided_slice %1 {offsets = [2, 0], sizes = [1, 128], strides = [1, 1]} : vector<8x128xf32> to vector<1x128xf32>
    %20 = vector.broadcast %18 : vector<256x1xf32> to vector<256x128xf32>
    %21 = vector.broadcast %19 : vector<1x128xf32> to vector<256x128xf32>
    %22 = arith.mulf %20, %21 : vector<256x128xf32>
    %23 = arith.addf %17, %22 : vector<256x128xf32>
    %24 = vector.extract_strided_slice %0 {offsets = [0, 3], sizes = [256, 1], strides = [1, 1]} : vector<256x8xf32> to vector<256x1xf32>
    %25 = vector.extract_strided_slice %1 {offsets = [3, 0], sizes = [1, 128], strides = [1, 1]} : vector<8x128xf32> to vector<1x128xf32>
    %26 = vector.broadcast %24 : vector<256x1xf32> to vector<256x128xf32>
    %27 = vector.broadcast %25 : vector<1x128xf32> to vector<256x128xf32>
    %28 = arith.mulf %26, %27 : vector<256x128xf32>
    %29 = arith.addf %23, %28 : vector<256x128xf32>
    %30 = math.tanh %29 : vector<256x128xf32>
    %31 = arith.truncf %30 : vector<256x128xf32> to vector<256x128xbf16>
    %c0_5 = arith.constant 0 : index
    %c0_6 = arith.constant 0 : index
    %c0_7 = arith.constant 0 : index
    %32 = vector.load %arg3[%c0_5, %c0_6, %c0_7] : memref<7x128x128xbf16, #tpu.memory_space<vmem>>, vector<1x128x128xbf16>
    %33 = vector.shape_cast %32 : vector<1x128x128xbf16> to vector<128x128xbf16>
    %cst = arith.constant dense<0.000000e+00> : vector<256x128xf32>
    %34 = tpu.matmul %31, %33, %cst {dimension_numbers = #tpu.dot_dimension_numbers<[1], [0], [0], [1], [0, 0, 1, 1], [], []>} : vector<256x128xbf16>, vector<128x128xbf16>, vector<256x128xf32> -> vector<256x128xf32>
    %c1 = arith.constant 1 : index
    %c0_8 = arith.constant 0 : index
    %35 = vector.load %arg4[%c1, %c0_8] : memref<8x128xf32, #tpu.memory_space<vmem>>, vector<1x128xf32>
    %36 = vector.shape_cast %35 : vector<1x128xf32> to vector<128xf32>
    %37 = vector.shape_cast %36 : vector<128xf32> to vector<1x128xf32>
    %38 = vector.broadcast %37 : vector<1x128xf32> to vector<256x128xf32>
    %39 = arith.addf %34, %38 : vector<256x128xf32>
    %40 = math.tanh %39 : vector<256x128xf32>
    %41 = arith.truncf %40 : vector<256x128xf32> to vector<256x128xbf16>
    %c1_9 = arith.constant 1 : index
    %c0_10 = arith.constant 0 : index
    %c0_11 = arith.constant 0 : index
    %42 = vector.load %arg3[%c1_9, %c0_10, %c0_11] : memref<7x128x128xbf16, #tpu.memory_space<vmem>>, vector<1x128x128xbf16>
    %43 = vector.shape_cast %42 : vector<1x128x128xbf16> to vector<128x128xbf16>
    %cst_12 = arith.constant dense<0.000000e+00> : vector<256x128xf32>
    %44 = tpu.matmul %41, %43, %cst_12 {dimension_numbers = #tpu.dot_dimension_numbers<[1], [0], [0], [1], [0, 0, 1, 1], [], []>} : vector<256x128xbf16>, vector<128x128xbf16>, vector<256x128xf32> -> vector<256x128xf32>
    %c2 = arith.constant 2 : index
    %c0_13 = arith.constant 0 : index
    %45 = vector.load %arg4[%c2, %c0_13] : memref<8x128xf32, #tpu.memory_space<vmem>>, vector<1x128xf32>
    %46 = vector.shape_cast %45 : vector<1x128xf32> to vector<128xf32>
    %47 = vector.shape_cast %46 : vector<128xf32> to vector<1x128xf32>
    %48 = vector.broadcast %47 : vector<1x128xf32> to vector<256x128xf32>
    %49 = arith.addf %44, %48 : vector<256x128xf32>
    %50 = math.tanh %49 : vector<256x128xf32>
    %51 = arith.truncf %50 : vector<256x128xf32> to vector<256x128xbf16>
    %c2_14 = arith.constant 2 : index
    %c0_15 = arith.constant 0 : index
    %c0_16 = arith.constant 0 : index
    %52 = vector.load %arg3[%c2_14, %c0_15, %c0_16] : memref<7x128x128xbf16, #tpu.memory_space<vmem>>, vector<1x128x128xbf16>
    %53 = vector.shape_cast %52 : vector<1x128x128xbf16> to vector<128x128xbf16>
    %cst_17 = arith.constant dense<0.000000e+00> : vector<256x128xf32>
    %54 = tpu.matmul %51, %53, %cst_17 {dimension_numbers = #tpu.dot_dimension_numbers<[1], [0], [0], [1], [0, 0, 1, 1], [], []>} : vector<256x128xbf16>, vector<128x128xbf16>, vector<256x128xf32> -> vector<256x128xf32>
    %c3 = arith.constant 3 : index
    %c0_18 = arith.constant 0 : index
    %55 = vector.load %arg4[%c3, %c0_18] : memref<8x128xf32, #tpu.memory_space<vmem>>, vector<1x128xf32>
    %56 = vector.shape_cast %55 : vector<1x128xf32> to vector<128xf32>
    %57 = vector.shape_cast %56 : vector<128xf32> to vector<1x128xf32>
    %58 = vector.broadcast %57 : vector<1x128xf32> to vector<256x128xf32>
    %59 = arith.addf %54, %58 : vector<256x128xf32>
    %60 = math.tanh %59 : vector<256x128xf32>
    %61 = arith.truncf %60 : vector<256x128xf32> to vector<256x128xbf16>
    %c3_19 = arith.constant 3 : index
    %c0_20 = arith.constant 0 : index
    %c0_21 = arith.constant 0 : index
    %62 = vector.load %arg3[%c3_19, %c0_20, %c0_21] : memref<7x128x128xbf16, #tpu.memory_space<vmem>>, vector<1x128x128xbf16>
    %63 = vector.shape_cast %62 : vector<1x128x128xbf16> to vector<128x128xbf16>
    %cst_22 = arith.constant dense<0.000000e+00> : vector<256x128xf32>
    %64 = tpu.matmul %61, %63, %cst_22 {dimension_numbers = #tpu.dot_dimension_numbers<[1], [0], [0], [1], [0, 0, 1, 1], [], []>} : vector<256x128xbf16>, vector<128x128xbf16>, vector<256x128xf32> -> vector<256x128xf32>
    %c4 = arith.constant 4 : index
    %c0_23 = arith.constant 0 : index
    %65 = vector.load %arg4[%c4, %c0_23] : memref<8x128xf32, #tpu.memory_space<vmem>>, vector<1x128xf32>
    %66 = vector.shape_cast %65 : vector<1x128xf32> to vector<128xf32>
    %67 = vector.shape_cast %66 : vector<128xf32> to vector<1x128xf32>
    %68 = vector.broadcast %67 : vector<1x128xf32> to vector<256x128xf32>
    %69 = arith.addf %64, %68 : vector<256x128xf32>
    %70 = math.tanh %69 : vector<256x128xf32>
    %71 = arith.truncf %70 : vector<256x128xf32> to vector<256x128xbf16>
    %c4_24 = arith.constant 4 : index
    %c0_25 = arith.constant 0 : index
    %c0_26 = arith.constant 0 : index
    %72 = vector.load %arg3[%c4_24, %c0_25, %c0_26] : memref<7x128x128xbf16, #tpu.memory_space<vmem>>, vector<1x128x128xbf16>
    %73 = vector.shape_cast %72 : vector<1x128x128xbf16> to vector<128x128xbf16>
    %cst_27 = arith.constant dense<0.000000e+00> : vector<256x128xf32>
    %74 = tpu.matmul %71, %73, %cst_27 {dimension_numbers = #tpu.dot_dimension_numbers<[1], [0], [0], [1], [0, 0, 1, 1], [], []>} : vector<256x128xbf16>, vector<128x128xbf16>, vector<256x128xf32> -> vector<256x128xf32>
    %c5 = arith.constant 5 : index
    %c0_28 = arith.constant 0 : index
    %75 = vector.load %arg4[%c5, %c0_28] : memref<8x128xf32, #tpu.memory_space<vmem>>, vector<1x128xf32>
    %76 = vector.shape_cast %75 : vector<1x128xf32> to vector<128xf32>
    %77 = vector.shape_cast %76 : vector<128xf32> to vector<1x128xf32>
    %78 = vector.broadcast %77 : vector<1x128xf32> to vector<256x128xf32>
    %79 = arith.addf %74, %78 : vector<256x128xf32>
    %80 = math.tanh %79 : vector<256x128xf32>
    %81 = arith.truncf %80 : vector<256x128xf32> to vector<256x128xbf16>
    %c5_29 = arith.constant 5 : index
    %c0_30 = arith.constant 0 : index
    %c0_31 = arith.constant 0 : index
    %82 = vector.load %arg3[%c5_29, %c0_30, %c0_31] : memref<7x128x128xbf16, #tpu.memory_space<vmem>>, vector<1x128x128xbf16>
    %83 = vector.shape_cast %82 : vector<1x128x128xbf16> to vector<128x128xbf16>
    %cst_32 = arith.constant dense<0.000000e+00> : vector<256x128xf32>
    %84 = tpu.matmul %81, %83, %cst_32 {dimension_numbers = #tpu.dot_dimension_numbers<[1], [0], [0], [1], [0, 0, 1, 1], [], []>} : vector<256x128xbf16>, vector<128x128xbf16>, vector<256x128xf32> -> vector<256x128xf32>
    %c6 = arith.constant 6 : index
    %c0_33 = arith.constant 0 : index
    %85 = vector.load %arg4[%c6, %c0_33] : memref<8x128xf32, #tpu.memory_space<vmem>>, vector<1x128xf32>
    %86 = vector.shape_cast %85 : vector<1x128xf32> to vector<128xf32>
    %87 = vector.shape_cast %86 : vector<128xf32> to vector<1x128xf32>
    %88 = vector.broadcast %87 : vector<1x128xf32> to vector<256x128xf32>
    %89 = arith.addf %84, %88 : vector<256x128xf32>
    %90 = math.tanh %89 : vector<256x128xf32>
    %91 = arith.truncf %90 : vector<256x128xf32> to vector<256x128xbf16>
    %c6_34 = arith.constant 6 : index
    %c0_35 = arith.constant 0 : index
    %c0_36 = arith.constant 0 : index
    %92 = vector.load %arg3[%c6_34, %c0_35, %c0_36] : memref<7x128x128xbf16, #tpu.memory_space<vmem>>, vector<1x128x128xbf16>
    %93 = vector.shape_cast %92 : vector<1x128x128xbf16> to vector<128x128xbf16>
    %cst_37 = arith.constant dense<0.000000e+00> : vector<256x128xf32>
    %94 = tpu.matmul %91, %93, %cst_37 {dimension_numbers = #tpu.dot_dimension_numbers<[1], [0], [0], [1], [0, 0, 1, 1], [], []>} : vector<256x128xbf16>, vector<128x128xbf16>, vector<256x128xf32> -> vector<256x128xf32>
    %c7 = arith.constant 7 : index
    %c0_38 = arith.constant 0 : index
    %95 = vector.load %arg4[%c7, %c0_38] : memref<8x128xf32, #tpu.memory_space<vmem>>, vector<1x128xf32>
    %96 = vector.shape_cast %95 : vector<1x128xf32> to vector<128xf32>
    %97 = vector.shape_cast %96 : vector<128xf32> to vector<1x128xf32>
    %98 = vector.broadcast %97 : vector<1x128xf32> to vector<256x128xf32>
    %99 = arith.addf %94, %98 : vector<256x128xf32>
    %c0_39 = arith.constant 0 : index
    %c0_40 = arith.constant 0 : index
    %100 = vector.load %arg5[%c0_39, %c0_40] : memref<256x128xf32, #tpu.memory_space<vmem>>, vector<256x128xf32>
    tpu.vector_store %arg5[%c0_39, %c0_40], %99 {strides = array<i32>} : memref<256x128xf32, #tpu.memory_space<vmem>>, vector<256x128xf32>,
    return
  }
  func.func @transform_0(%arg0: i32) -> (i32, i32) {
    %c0_i32 = arith.constant 0 : i32
    %c0_i32_0 = arith.constant 0 : i32
    return %arg0, %c0_i32 : i32, i32
  }
  func.func @transform_1(%arg0: i32) -> (i32, i32) {
    %c0_i32 = arith.constant 0 : i32
    %c0_i32_0 = arith.constant 0 : i32
    %c0_i32_1 = arith.constant 0 : i32
    return %c0_i32, %c0_i32_0 : i32, i32
  }
  func.func @transform_2(%arg0: i32) -> (i32, i32, i32) {
    %c0_i32 = arith.constant 0 : i32
    %c0_i32_0 = arith.constant 0 : i32
    %c0_i32_1 = arith.constant 0 : i32
    %c0_i32_2 = arith.constant 0 : i32
    return %c0_i32, %c0_i32_0, %c0_i32_1 : i32, i32, i32
  }
  func.func @transform_3(%arg0: i32) -> (i32, i32) {
    %c0_i32 = arith.constant 0 : i32
    %c0_i32_0 = arith.constant 0 : i32
    %c0_i32_1 = arith.constant 0 : i32
    return %c0_i32, %c0_i32_0 : i32, i32
  }
  func.func @transform_4(%arg0: i32) -> (i32, i32) {
    %c0_i32 = arith.constant 0 : i32
    %c0_i32_0 = arith.constant 0 : i32
    return %arg0, %c0_i32 : i32, i32
  }
}

</mosaic_0001>

<bundles_post_ra>
// kernel: porosity_pinn_forward.1
= control target key start
LH: loop header
LB: loop body
LE: loop exit
PB: predicated region body
PF: predicated region fallthrough
CT: control target
= control target key end

     0   :  { %s4378_s15 = smov 0   ;;  %s5482_s0 = inlined_call_operand.vmem [shape: f32[1024,8], index: 0, kind: input, shape index: {}]   ;;  %s5483_s1 = inlined_call_operand.vmem [shape: f32[8,128], index: 1, kind: input, shape index: {}]   ;;  %s5484_s2 = inlined_call_operand.vmem [shape: bf16[7,128,128], index: 2, kind: input, shape index: {}]   ;;  %s5485_s3 = inlined_call_operand.vmem [shape: f32[8,128], index: 3, kind: input, shape index: {}]   ;;  %s5486_s4 = inlined_call_operand.vmem [shape: f32[1024,128], index: 4, kind: output, shape index: {}]  }
   0x1 LB: > { %s3096_s16 = sadd.s32 4294967295, %s4347_s15   ;;  %p3100_p0 = scmp.ge.s32.totalorder %s4347_s15, 1  ;;  %s4347_s15 = sphi %s4378_s15, %s14_s15  }
   0x2   : > { %p163_p1 = scmp.lt.s32.totalorder %s4347_s15, 5 }
   0x4   : > { %p164_p2 = pnand %p3100_p0, %p163_p1 }
   0x6   : > { %167 = sbr.rel (%p164_p2) target bundleno = 2112 (0x840), region = 36 }
   0xd   : > { %s3101_s17 = sshll.u32 %s3096_s16, 5  ;;  %v5489_v0 = vmov 0   ;;  %v5493_v6 = vmov 1   ;;  %v5491_v10 = vmov 2   ;;  %v5487_v14 = vmov 3   ;;  %v3835_v31 = vld [vmem:[%s5484_s2] sm:$0xff]  }
   0xe   : > { %3800 = vset.pattern.permute.xlu1 %v5489_v0  ;;  %3799 = vset.pattern.permute.xlu0 %v5489_v0  ;;  %p190_p3 = scmp.lt.s32.totalorder %s3101_s17, 127  ;;  %v3836_v32 = vld [vmem:[%s5484_s2 + $0x8] sm:$0xff]   ;;  %v3837_v36 = vld [vmem:[%s5484_s2 + $0x10] sm:$0xff]   ;;  %v3838_v39 = vld [vmem:[%s5484_s2 + $0x18] sm:$0xff]   ;;  %v396_v47 = vlaneseq }
   0xf   : > { %3435 = vmatprep.subr.bf16.mxu0 %v3835_v31  ;;  %3771 = vmatprep.subr.bf16.mxu1 %v3835_v31  ;;  %v3839_v42 = vld [vmem:[%s5484_s2 + $0x20] sm:$0xff]   ;;  %v3840_v45 = vld [vmem:[%s5484_s2 + $0x28] sm:$0xff]   ;;  %v3841_v49 = vld [vmem:[%s5484_s2 + $0x30] sm:$0xff]  }
  0x10   : > { %s5544_s17 = smov (!%p190_p3, %s3101_s17), 127  ;;  %3436 = vmatpush3.bf16.msra.mxu0 %v3835_v31  ;;  %3779 = vmatpush3.bf16.msra.mxu1 %v3835_v31  ;;  %v4594_v51 = vshrl.u32 %v396_v47, 7  ;;  %v3842_v53 = vld [vmem:[%s5484_s2 + $0x38] sm:$0xff]   ;;  %v4612_v57 = vld [vmem:[%s5483_s1] sm:$0xff] }
  0x11   : > { %s3102_s18 = sshll.u32 %s5544_s17, 3  ;;  %3437 = vmatprep.subr.bf16.mxu0 %v3836_v32  ;;  %3772 = vmatprep.subr.bf16.mxu1 %v3836_v32 }
  0x12   : > { %s4396_s21 = scalar_lea.vmem %s5482_s0, %s3102_s18  ;;  %v398_v55 = vsub.s32 0, %v4594_v51  ;;  %v598_v62 = vsub.s32 1, %v4594_v51  ;;  %s5413_s16 = scalar_lea.vmem %s5486_s4, %s3102_s18 }
  0x13   : > { %v204_v1 = vld [vmem:[%s4396_s21 + $0x10] sm:$0xff]  ;;  %v4400_v2 = vld [vmem:[%s4396_s21] sm:$0xff]  ;;  %v4404_v3 = vld [vmem:[%s4396_s21 + $0x18] sm:$0xff] }
  0x14   : > { %248 = vperm.xlu1 %3800, %v204_v1   ;;  %238 = vperm.xlu0 %3799, %v4400_v2   ;;  %v4407_v4 = vld [vmem:[%s4396_s21 + $0x8] sm:$0xff]  ;;  %v4447_v15 = vld [vmem:[%s4396_s21 + $0x20] sm:$0xff]  ;;  %v208_v16 = vld [vmem:[%s4396_s21 + $0x30] sm:$0xff]  ;;  %v4619_v59 = vrot.slane %v4612_v57, %v398_v55 }
  0x15   : > { %v4412_v5 = vld [vmem:[%s4396_s21 + $0x28] sm:$0xff]  ;;  %v4457_v17 = vld [vmem:[%s4396_s21 + $0x38] sm:$0xff]  ;;  %v4462_v18 = vld [vmem:[%s4396_s21 + $0x40] sm:$0xff]  ;;  %3438 = vmatpush3.bf16.msra.mxu0 %v3836_v32  ;;  %3780 = vmatpush3.bf16.msra.mxu1 %v3836_v32 }
  0x16   : > { %v4417_v7 = vld [vmem:[%s4396_s21 + $0x48] sm:$0xff]  ;;  %v4468_v19 = vld [vmem:[%s4396_s21 + $0x58] sm:$0xff]  ;;  %v4472_v20 = vld [vmem:[%s4396_s21 + $0x60] sm:$0xff]  ;;  %3439 = vmatprep.subr.bf16.mxu0 %v3837_v36  ;;  %3773 = vmatprep.subr.bf16.mxu1 %v3837_v36 }
  0x17   : > { %v4421_v8 = vld [vmem:[%s4396_s21 + $0x68] sm:$0xff]  ;;  %v4478_v21 = vld [vmem:[%s4396_s21 + $0x78] sm:$0xff]  ;;  %v4482_v22 = vld [vmem:[%s4396_s21 + $0x80] sm:$0xff] }
  0x18   : > { %253 = vperm.xlu1 %3800, %v4404_v3   ;;  %243 = vperm.xlu0 %3799, %v4407_v4   ;;  %v4425_v9 = vld [vmem:[%s4396_s21 + $0x88] sm:$0xff]  ;;  %v4487_v23 = vld [vmem:[%s4396_s21 + $0x98] sm:$0xff]  ;;  %v4492_v24 = vld [vmem:[%s4396_s21 + $0xa0] sm:$0xff] }
  0x19   : > { %v4431_v11 = vld [vmem:[%s4396_s21 + $0xa8] sm:$0xff]  ;;  %v4497_v25 = vld [vmem:[%s4396_s21 + $0xb8] sm:$0xff]  ;;  %v4501_v26 = vld [vmem:[%s4396_s21 + $0xc0] sm:$0xff]  ;;  %3440 = vmatpush3.bf16.msra.mxu0 %v3837_v36  ;;  %3781 = vmatpush3.bf16.msra.mxu1 %v3837_v36 }
  0x1a   : > { %v4435_v12 = vld [vmem:[%s4396_s21 + $0xc8] sm:$0xff]  ;;  %v212_v27 = vld [vmem:[%s4396_s21 + $0x50] sm:$0xff]  ;;  %v4508_v28 = vld [vmem:[%s4396_s21 + $0xd8] sm:$0xff]  ;;  %3441 = vmatprep.subr.bf16.mxu0 %v3838_v39  ;;  %3774 = vmatprep.subr.bf16.mxu1 %v3838_v39 }
  0x1b   : > { %v4440_v13 = vld [vmem:[%s4396_s21 + $0xe8] sm:$0xff]  ;;  %v4512_v29 = vld [vmem:[%s4396_s21 + $0xe0] sm:$0xff]  ;;  %v4517_v30 = vld [vmem:[%s4396_s21 + $0xf8] sm:$0xff] }
  0x1c   : > { %3801 = vset.pattern.permute.xlu1 %v5493_v6  ;;  %263 = vperm.xlu0 %3799, %v4412_v5   ;;  %5499 = vst [vmem:[#allocation2_spill] sm:$0xff] %v4512_v29  ;;  %5500 = vst [vmem:[#allocation3_spill] sm:$0xff] %v4517_v30  ;;  %v4548_v35 = vld [vmem:[%s4396_s21 + $0x70] sm:$0xff] }
  0x1d   : > { %473 = vperm.xlu1 %3801, %v4407_v4   ;;  %3442 = vmatpush3.bf16.msra.mxu0 %v3838_v39 }
  0x1e   : > { %3782 = vmatpush3.bf16.msra.mxu1 %v3838_v39  ;;  %3443 = vmatprep.subr.bf16.mxu0 %v3839_v42 }
  0x1f   : > { %3775 = vmatprep.subr.bf16.mxu1 %v3839_v42 }
  0x20   : > { %283 = vperm.xlu0 %3799, %v4417_v7  }
  0x21   : > { %477 = vperm.xlu1 %3801, %v204_v1   ;;  %3444 = vmatpush3.bf16.msra.mxu0 %v3839_v42 }
  0x22   : > { %3783 = vmatpush3.bf16.msra.mxu1 %v3839_v42  ;;  %3445 = vmatprep.subr.bf16.mxu0 %v3840_v45 }
  0x23   : > { %3776 = vmatprep.subr.bf16.mxu1 %v3840_v45 }
  0x24   : > { %303 = vperm.xlu0 %3799, %v4421_v8  }
  0x25   : > { %3802 = vset.pattern.permute.xlu1 %v5491_v10  ;;  %3446 = vmatpush3.bf16.msra.mxu0 %v3840_v45 }
  0x26   : > { %665 = vperm.xlu1 %3802, %v4400_v2   ;;  %3784 = vmatpush3.bf16.msra.mxu1 %v3840_v45 }
  0x27   : > { %3447 = vmatprep.subr.bf16.mxu0 %v3841_v49  ;;  %3777 = vmatprep.subr.bf16.mxu1 %v3841_v49 }
  0x28   : > { %323 = vperm.xlu0 %3799, %v4425_v9  }
  0x29   : > { %3448 = vmatpush3.bf16.msra.mxu0 %v3841_v49 }
  0x2a   : > { %673 = vperm.xlu1 %3802, %v204_v1   ;;  %3785 = vmatpush3.bf16.msra.mxu1 %v3841_v49 }
  0x2b   : > { %3449 = vmatprep.subr.bf16.mxu0 %v3842_v53  ;;  %3778 = vmatprep.subr.bf16.mxu1 %v3842_v53 }
  0x2c   : > { %343 = vperm.xlu0 %3799, %v4431_v11  }
  0x2d   : > { %3450 = vmatpush3.bf16.msra.mxu0 %v3842_v53 }
  0x2e   : > { %677 = vperm.xlu1 %3802, %v4404_v3   ;;  %3786 = vmatpush3.bf16.msra.mxu1 %v3842_v53 }
  0x30   : > { %363 = vperm.xlu0 %3799, %v4435_v12  }
  0x32   : > { %3803 = vset.pattern.permute.xlu1 %v5487_v14 }
  0x33   : > { %865 = vperm.xlu1 %3803, %v4407_v4  }
  0x34   : > { %383 = vperm.xlu0 %3799, %v4440_v13  }
  0x37   : > { %869 = vperm.xlu1 %3803, %v204_v1   ;;  %v4633_v1 = vld [vmem:[%s5485_s3] ss:$0 sm:$0xff] }
  0x38   : > { %3829 = vset.pattern.permute.xlu0 %v5493_v6 }
  0x39   : > { %469 = vperm.xlu0 %3829, %v4400_v2  }
  0x3b   : > { %3804 = vset.pattern.permute.xlu1 %v5489_v0 }
  0x3c   : > { %258 = vperm.xlu1 %3804, %v4447_v15  }
  0x3d   : > { %481 = vperm.xlu0 %3829, %v4404_v3  }
  0x40   : > { %268 = vperm.xlu1 %3804, %v208_v16  }
  0x41   : > { %485 = vperm.xlu0 %3829, %v4447_v15  }
  0x44   : > { %273 = vperm.xlu1 %3804, %v4457_v17  }
  0x45   : > { %497 = vperm.xlu0 %3829, %v4457_v17  }
  0x48   : > { %3805 = vset.pattern.permute.xlu1 %v5493_v6 }
  0x49   : > { %489 = vperm.xlu1 %3805, %v4412_v5   ;;  %501 = vperm.xlu0 %3829, %v4462_v18  }
  0x4d   : > { %493 = vperm.xlu1 %3805, %v208_v16   ;;  %513 = vperm.xlu0 %3829, %v4468_v19  }
  0x51   : > { %3806 = vset.pattern.permute.xlu1 %v5491_v10  ;;  %517 = vperm.xlu0 %3829, %v4472_v20  }
  0x52   : > { %681 = vperm.xlu1 %3806, %v4447_v15  }
  0x55   : > { %529 = vperm.xlu0 %3829, %v4478_v21  }
  0x56   : > { %689 = vperm.xlu1 %3806, %v208_v16  }
  0x59   : > { %533 = vperm.xlu0 %3829, %v4482_v22  }
  0x5a   : > { %693 = vperm.xlu1 %3806, %v4457_v17  }
  0x5d   : > { %545 = vperm.xlu0 %3829, %v4487_v23  }
  0x5e   : > { %3807 = vset.pattern.permute.xlu1 %v5487_v14 }
  0x5f   : > { %881 = vperm.xlu1 %3807, %v4412_v5  }
  0x61   : > { %549 = vperm.xlu0 %3829, %v4492_v24  }
  0x63   : > { %885 = vperm.xlu1 %3807, %v208_v16  }
  0x65   : > { %561 = vperm.xlu0 %3829, %v4497_v25  }
  0x67   : > { %3808 = vset.pattern.permute.xlu1 %v5489_v0 }
  0x68   : > { %278 = vperm.xlu1 %3808, %v4462_v18  }
  0x69   : > { %565 = vperm.xlu0 %3829, %v4501_v26  }
  0x6c   : > { %288 = vperm.xlu1 %3808, %v212_v27  }
  0x6d   : > { %577 = vperm.xlu0 %3829, %v4508_v28  }
  0x70   : > { %293 = vperm.xlu1 %3808, %v4468_v19  }
  0x71   : > { %581 = vperm.xlu0 %3829, %v4512_v29  }
  0x74   : > { %3809 = vset.pattern.permute.xlu1 %v5493_v6 }
  0x75   : > { %505 = vperm.xlu1 %3809, %v4417_v7   ;;  %593 = vperm.xlu0 %3829, %v4517_v30  }
  0x79   : > { %509 = vperm.xlu1 %3809, %v212_v27   ;;  %3831 = vset.pattern.permute.xlu0 %v5491_v10 }
  0x7a   : > { %669 = vperm.xlu0 %3831, %v4407_v4   ;;  %v4640_v4 = vrot.slane %v4612_v57, %v598_v62 }
  0x7d   : > { %3810 = vset.pattern.permute.xlu1 %v5491_v10 }
  0x7e   : > { %697 = vperm.xlu1 %3810, %v4462_v18   ;;  %685 = vperm.xlu0 %3831, %v4412_v5  }
  0x82   : > { %705 = vperm.xlu1 %3810, %v212_v27   ;;  %701 = vperm.xlu0 %3831, %v4417_v7  }
  0x86   : > { %709 = vperm.xlu1 %3810, %v4468_v19   ;;  %717 = vperm.xlu0 %3831, %v4421_v8  }
  0x8a   : > { %3811 = vset.pattern.permute.xlu1 %v5487_v14  ;;  %733 = vperm.xlu0 %3831, %v4425_v9  }
  0x8b   : > { %897 = vperm.xlu1 %3811, %v4417_v7  }
  0x8e   : > { %749 = vperm.xlu0 %3831, %v4431_v11  }
  0x8f   : > { %901 = vperm.xlu1 %3811, %v212_v27  }
  0x92   : > { %765 = vperm.xlu0 %3831, %v4435_v12  }
  0x93   : > { %v4541_v33 = vpop.permute.xlu1 %248  ;;  %3812 = vset.pattern.permute.xlu1 %v5489_v0  ;;  %v4544_v34 = vpop.permute.xlu0 %238 }
  0x94   : > { %298 = vperm.xlu1 %3812, %v4472_v20   ;;  %v400_v61 = vmul.f32 %v4619_v59, %v4544_v34 }
  0x96   : > { %781 = vperm.xlu0 %3831, %v4440_v13  }
  0x97   : > { %v4554_v37 = vpop.permute.xlu1 %253  ;;  %v4556_v38 = vpop.permute.xlu0 %243 }
  0x98   : > { %308 = vperm.xlu1 %3812, %v4548_v35  }
  0x9a   : > { %3833 = vset.pattern.permute.xlu0 %v5487_v14 }
  0x9b   : > { %861 = vperm.xlu0 %3833, %v4400_v2   ;;  %v4564_v40 = vpop.permute.xlu0 %263 }
  0x9c   : > { %v4566_v41 = vpop.permute.xlu1 %473  ;;  %313 = vperm.xlu1 %3812, %v4478_v21  }
  0x9f   : > { %873 = vperm.xlu0 %3833, %v4404_v3   ;;  %v4573_v43 = vpop.permute.xlu0 %283  ;;  %v436_v3 = vadd.f32 %v4633_v1, %v400_v61 }
  0xa0   : > { %v4575_v44 = vpop.permute.xlu1 %477  ;;  %3813 = vset.pattern.permute.xlu1 %v5493_v6 }
  0xa1   : > { %521 = vperm.xlu1 %3813, %v4421_v8  }
  0xa3   : > { %877 = vperm.xlu0 %3833, %v4447_v15   ;;  %v4583_v46 = vpop.permute.xlu0 %303 }
  0xa5   : > { %525 = vperm.xlu1 %3813, %v4548_v35   ;;  %v4586_v48 = vpop.permute.xlu1 %665 }
  0xa7   : > { %889 = vperm.xlu0 %3833, %v4457_v17   ;;  %v4592_v50 = vpop.permute.xlu0 %323 }
  0xa8   : > { %5501 = vst [vmem:[#allocation4_spill] sm:$0xff] %v4592_v50 }
  0xa9   : > { %3814 = vset.pattern.permute.xlu1 %v5491_v10  ;;  %v4597_v52 = vpop.permute.xlu1 %673 }
  0xaa   : > { %713 = vperm.xlu1 %3814, %v4472_v20  }
  0xab   : > { %893 = vperm.xlu0 %3833, %v4462_v18   ;;  %v4604_v54 = vpop.permute.xlu0 %343  ;;  %v220_v18 = vld [vmem:[%s4396_s21 + $0x90] sm:$0xff] }
  0xac   : > { %5502 = vst [vmem:[#allocation5_spill] sm:$0xff] %v4604_v54  ;;  %v401_v54 = vmul.f32 %v4619_v59, %v4556_v38  ;;  %v990_v38 = vsub.s32 3, %v4594_v51 }
  0xad   : > { %v4607_v56 = vpop.permute.xlu1 %677 }
  0xae   : > { %721 = vperm.xlu1 %3814, %v4548_v35   ;;  %v437_v50 = vadd.f32 %v4633_v1, %v401_v54  ;;  %v405_v54 = vmul.f32 %v4619_v59, %v4564_v40 }
  0xaf   : > { %905 = vperm.xlu0 %3833, %v4468_v19   ;;  %v4616_v58 = vpop.permute.xlu0 %363 }
  0xb0   : > { %5503 = vst [vmem:[#allocation6_spill] sm:$0xff] %v4616_v58 }
  0xb2   : > { %725 = vperm.xlu1 %3814, %v4478_v21   ;;  %v4622_v60 = vpop.permute.xlu1 %865 }
  0xb3   : > { %909 = vperm.xlu0 %3833, %v4472_v20   ;;  %v4628_v63 = vpop.permute.xlu0 %383 }
  0xb4   : > { %5504 = vst [vmem:[#allocation7_spill] sm:$0xff] %v4628_v63 }
  0xb6   : > { %3815 = vset.pattern.permute.xlu1 %v5487_v14  ;;  %v4636_v2 = vpop.permute.xlu1 %869 }
  0xb7   : > { %913 = vperm.xlu1 %3815, %v4421_v8   ;;  %921 = vperm.xlu0 %3833, %v4478_v21  }
  0xb8   : > { %v470_v5 = vpop.permute.xlu0 %469 }
  0xb9   : > { %v600_v7 = vmul.f32 %v4640_v4, %v470_v5  ;;  %v224_v5 = vld [vmem:[%s4396_s21 + $0xb0] sm:$0xff] }
  0xbb   : > { %v4645_v13 = vadd.f32 %v600_v7, %v436_v3  ;;  %917 = vperm.xlu1 %3815, %v4548_v35   ;;  %v4648_v15 = vpop.permute.xlu1 %258  ;;  %925 = vperm.xlu0 %3833, %v4482_v22  }
  0xbc   : > { %v4651_v16 = vpop.permute.xlu0 %481 }
  0xbf   : > { %3816 = vset.pattern.permute.xlu1 %v5489_v0  ;;  %v4654_v17 = vpop.permute.xlu1 %268  ;;  %937 = vperm.xlu0 %3833, %v4487_v23  }
  0xc0   : > { %318 = vperm.xlu1 %3816, %v4482_v22   ;;  %v4658_v8 = vpop.permute.xlu0 %485 }
  0xc3   : > { %v4661_v19 = vpop.permute.xlu1 %273  ;;  %941 = vperm.xlu0 %3833, %v4492_v24  }
  0xc4   : > { %328 = vperm.xlu1 %3816, %v220_v18   ;;  %v4664_v20 = vpop.permute.xlu0 %497 }
  0xc7   : > { %953 = vperm.xlu0 %3833, %v4497_v25  }
  0xc8   : > { %333 = vperm.xlu1 %3816, %v4487_v23   ;;  %v4668_v21 = vpop.permute.xlu1 %489  ;;  %v4670_v27 = vpop.permute.xlu0 %501 }
  0xcb   : > { %957 = vperm.xlu0 %3833, %v4501_v26  }
  0xcc   : > { %3817 = vset.pattern.permute.xlu1 %v5493_v6  ;;  %v4674_v31 = vpop.permute.xlu1 %493  ;;  %v4676_v32 = vpop.permute.xlu0 %513 }
  0xcd   : > { %537 = vperm.xlu1 %3817, %v4425_v9  }
  0xcf   : > { %969 = vperm.xlu0 %3833, %v4508_v28  }
  0xd0   : > { %v4680_v34 = vpop.permute.xlu0 %517 }
  0xd1   : > { %541 = vperm.xlu1 %3817, %v220_v18   ;;  %v4682_v35 = vpop.permute.xlu1 %681 }
  0xd3   : > { %973 = vperm.xlu0 %3833, %v4512_v29   ;;  %v402_v29 = vmul.f32 %v4619_v59, %v4541_v33 }
  0xd4   : > { %v4685_v36 = vpop.permute.xlu0 %529 }
  0xd5   : > { %3818 = vset.pattern.permute.xlu1 %v5491_v10  ;;  %v4688_v39 = vpop.permute.xlu1 %689  ;;  %v438_v33 = vadd.f32 %v4633_v1, %v402_v29 }
  0xd6   : > { %729 = vperm.xlu1 %3818, %v4482_v22  }
  0xd7   : > { %985 = vperm.xlu0 %3833, %v4517_v30   ;;  %v5517_v30 = vmov 3  }
  0xd8   : > { %v4692_v42 = vpop.permute.xlu0 %533 }
  0xd9   : > { %5505 = vst [vmem:[#allocation8_spill] sm:$0xff] %v4692_v42  ;;  %v4694_v45 = vpop.permute.xlu1 %693 }
  0xda   : > { %737 = vperm.xlu1 %3818, %v220_v18  }
  0xdc   : > { %v4696_v47 = vpop.permute.xlu0 %545 }
  0xdd   : > { %5506 = vst [vmem:[#allocation9_spill] sm:$0xff] %v4696_v47  ;;  %v794_v47 = vsub.s32 2, %v4594_v51 }
  0xde   : > { %741 = vperm.xlu1 %3818, %v4487_v23   ;;  %v4699_v49 = vpop.permute.xlu1 %881 }
  0xe0   : > { %v4701_v53 = vpop.permute.xlu0 %549 }
  0xe1   : > { %5507 = vst [vmem:[#allocation10_spill] sm:$0xff] %v4701_v53 }
  0xe2   : > { %3819 = vset.pattern.permute.xlu1 %v5487_v14  ;;  %v4704_v55 = vpop.permute.xlu1 %885 }
  0xe3   : > { %929 = vperm.xlu1 %3819, %v4425_v9  }
  0xe4   : > { %v4707_v22 = vpop.permute.xlu0 %561 }
  0xe5   : > { %5508 = vst [vmem:[#allocation11_spill] sm:$0xff] %v4707_v22 }
  0xe7   : > { %933 = vperm.xlu1 %3819, %v220_v18   ;;  %v4709_v61 = vpop.permute.xlu1 %278 }
  0xe8   : > { %v4711_v62 = vpop.permute.xlu0 %565 }
  0xe9   : > { %5509 = vst [vmem:[#allocation12_spill] sm:$0xff] %v4711_v62  ;;  %v5513_v62 = vmov 2  }
  0xeb   : > { %3820 = vset.pattern.permute.xlu1 %v5489_v0  ;;  %v4714_v23 = vpop.permute.xlu1 %288 }
  0xec   : > { %338 = vperm.xlu1 %3820, %v4492_v24   ;;  %v4717_v3 = vpop.permute.xlu0 %577 }
  0xed   : > { %5510 = vst [vmem:[#allocation13_spill] sm:$0xff] %v4717_v3 }
  0xef   : > { %v4720_v7 = vpop.permute.xlu1 %293 }
  0xf0   : > { %348 = vperm.xlu1 %3820, %v224_v5   ;;  %v4722_v9 = vpop.permute.xlu0 %581 }
  0xf1   : > { %5511 = vst [vmem:[#allocation14_spill] sm:$0xff] %v4722_v9 }
  0xf4   : > { %353 = vperm.xlu1 %3820, %v4497_v25   ;;  %v4725_v18 = vpop.permute.xlu1 %505  ;;  %v4727_v14 = vpop.permute.xlu0 %593 }
  0xf5   : > { %5512 = vst [vmem:[#allocation15_spill] sm:$0xff] %v4727_v14 }
  0xf8   : > { %3821 = vset.pattern.permute.xlu1 %v5493_v6  ;;  %v4730_v0 = vpop.permute.xlu1 %509 }
  0xf9   : > { %553 = vperm.xlu1 %3821, %v4431_v11   ;;  %v670_v10 = vpop.permute.xlu0 %669 }
  0xfd   : > { %557 = vperm.xlu1 %3821, %v224_v5   ;;  %v4733_v63 = vpop.permute.xlu1 %697  ;;  %v686_v3 = vpop.permute.xlu0 %685 }
 0x101   : > { %3822 = vset.pattern.permute.xlu1 %v5513_v62  ;;  %v4736_v9 = vpop.permute.xlu1 %705  ;;  %v4738_v58 = vpop.permute.xlu0 %701 }
 0x102   : > { %745 = vperm.xlu1 %3822, %v4492_v24  }
 0x105   : > { %v4741_v14 = vpop.permute.xlu1 %709  ;;  %v4743_v6 = vpop.permute.xlu0 %717 }
 0x106   : > { %5514 = vst [vmem:[#allocation16_spill] sm:$0xff] %v4743_v6  ;;  %753 = vperm.xlu1 %3822, %v224_v5   ;;  %v4780_v6 = vrot.slane %v4612_v57, %v990_v38  ;;  %v605_v38 = vmul.f32 %v4640_v4, %v4668_v21  ;;  %v407_v21 = vmul.f32 %v4619_v59, %v4661_v19 }
 0x107   : > { %v606_v19 = vmul.f32 %v4640_v4, %v4674_v31 }
 0x109   : > { %v4745_v22 = vpop.permute.xlu0 %733 }
 0x10a   : > { %5515 = vst [vmem:[#allocation17_spill] sm:$0xff] %v4745_v22  ;;  %757 = vperm.xlu1 %3822, %v4497_v25   ;;  %v4748_v53 = vpop.permute.xlu1 %897  ;;  %v601_v25 = vmul.f32 %v4640_v4, %v4566_v41  ;;  %v4763_v22 = vrot.slane %v4612_v57, %v794_v47  ;;  %v602_v41 = vmul.f32 %v4640_v4, %v4575_v44 }
 0x10b   : > { %v603_v57 = vmul.f32 %v4640_v4, %v4651_v16 }
 0x10c   : > { %v633_v51 = vadd.f32 %v601_v25, %v437_v50  ;;  %v634_v50 = vadd.f32 %v602_v41, %v438_v33  ;;  %v5520_v25 = vmov 0   ;;  %v800_v31 = vmul.f32 %v4763_v22, %v4682_v35 }
 0x10d   : > { %v4753_v42 = vpop.permute.xlu0 %749 }
 0x10e   : > { %5516 = vst [vmem:[#allocation18_spill] sm:$0xff] %v4753_v42  ;;  %3823 = vset.pattern.permute.xlu1 %v5517_v30  ;;  %v4756_v24 = vpop.permute.xlu1 %901  ;;  %v797_v30 = vmul.f32 %v4763_v22, %v670_v10  ;;  %v409_v10 = vmul.f32 %v4619_v59, %v4573_v43  ;;  %v993_v43 = vmul.f32 %v4780_v6, %v4622_v60 }
 0x10f   : > { %945 = vperm.xlu1 %3823, %v4431_v11   ;;  %v403_v11 = vmul.f32 %v4619_v59, %v4554_v37  ;;  %v798_v37 = vmul.f32 %v4763_v22, %v4597_v52  ;;  %v994_v52 = vmul.f32 %v4780_v6, %v4636_v2  ;;  %v796_v60 = vmul.f32 %v4763_v22, %v4586_v48 }
 0x110   : > { %v829_v40 = vadd.f32 %v797_v30, %v633_v51  ;;  %v404_v30 = vmul.f32 %v4619_v59, %v4648_v15  ;;  %v4806_v16 = vadd.f32 %v4633_v1, %v409_v10  ;;  %v406_v2 = vmul.f32 %v4619_v59, %v4654_v17 }
 0x111   : > { %v4768_v42 = vpop.permute.xlu0 %765  ;;  %v439_v44 = vadd.f32 %v4633_v1, %v403_v11  ;;  %v4810_v11 = vmul.f32 %v4619_v59, %v4583_v46  ;;  %v830_v15 = vadd.f32 %v798_v37, %v634_v50  ;;  %v801_v51 = vmul.f32 %v4763_v22, %v686_v3 }
 0x112   : > { %5518 = vst [vmem:[#allocation19_spill] sm:$0xff] %v4768_v42  ;;  %v1025_v41 = vadd.f32 %v993_v43, %v829_v40  ;;  %v799_v46 = vmul.f32 %v4763_v22, %v4607_v56  ;;  %v440_v37 = vadd.f32 %v4633_v1, %v404_v30  ;;  %v442_v3 = vadd.f32 %v4633_v1, %v406_v2 }
 0x113   : > { %949 = vperm.xlu1 %3823, %v224_v5   ;;  %v4777_v47 = vpop.permute.xlu1 %298  ;;  %v441_v5 = vadd.f32 %v4633_v1, %v405_v54  ;;  %v4817_v54 = vld [vmem:[%s4396_s21 + $0xd0] sm:$0xff]  ;;  %v635_v10 = vadd.f32 %v603_v57, %v439_v44  ;;  %v1026_v17 = vadd.f32 %v994_v52, %v830_v15  ;;  %v604_v56 = vmul.f32 %v4640_v4, %v4658_v8 }
 0x114   : > { %v443_v44 = vadd.f32 %v4633_v1, %v407_v21  ;;  %v802_v57 = vmul.f32 %v4763_v22, %v4688_v39  ;;  %3891 = vtanh.f32 %v1025_v41  ;;  %v638_v8 = vadd.f32 %v606_v19, %v442_v3 }
 0x115   : > { %v4785_v42 = vpop.permute.xlu0 %781  ;;  %v637_v50 = vadd.f32 %v605_v38, %v441_v5  ;;  %v831_v52 = vadd.f32 %v799_v46, %v635_v10  ;;  %v408_v39 = vmul.f32 %v4619_v59, %v4709_v61  ;;  %v636_v35 = vadd.f32 %v604_v56, %v440_v37 }
 0x116   : > { %5519 = vst [vmem:[#allocation20_spill] sm:$0xff] %v4785_v42  ;;  %v828_v42 = vadd.f32 %v796_v60, %v4645_v13  ;;  %v607_v13 = vmul.f32 %v4640_v4, %v4664_v20  ;;  %v997_v20 = vmul.f32 %v4780_v6, %v4699_v49  ;;  %v803_v60 = vmul.f32 %v4763_v22, %v4694_v45 }
 0x117   : > { %3824 = vset.pattern.permute.xlu1 %v5520_v25  ;;  %v4794_v29 = vpop.permute.xlu1 %308  ;;  %v833_v5 = vadd.f32 %v801_v51, %v637_v50  ;;  %v834_v21 = vadd.f32 %v802_v57, %v638_v8  ;;  %v609_v49 = vmul.f32 %v4640_v4, %v4725_v18  ;;  %v832_v51 = vadd.f32 %v800_v31, %v636_v35 }
 0x118   : > { %358 = vperm.xlu1 %3824, %v4501_v26   ;;  %v639_v15 = vadd.f32 %v607_v13, %v443_v44  ;;  %v410_v61 = vmul.f32 %v4619_v59, %v4714_v23  ;;  %v608_v46 = vmul.f32 %v4640_v4, %v4670_v27  ;;  %v444_v45 = vadd.f32 %v4633_v1, %v408_v39 }
 0x119   : > { %v1029_v41 = vadd.f32 %v997_v20, %v833_v5  ;;  %v411_v23 = vmul.f32 %v4619_v59, %v4720_v7  ;;  %v610_v50 = vmul.f32 %v4640_v4, %v4730_v0  ;;  %v641_v27 = vadd.f32 %v609_v49, %v4806_v16 }
 0x11a   : > { %v862_v33 = vpop.permute.xlu0 %861  ;;  %v835_v37 = vadd.f32 %v803_v60, %v639_v15  ;;  %v804_v3 = vmul.f32 %v4763_v22, %v4733_v63  ;;  %v446_v13 = vadd.f32 %v4633_v1, %v410_v61  ;;  %v806_v7 = vmul.f32 %v4763_v22, %v4736_v9 }
 0x11b   : > { %v992_v48 = vmul.f32 %v4780_v6, %v862_v33  ;;  %v4826_v25 = vpop.permute.xlu1 %313  ;;  %v611_v16 = vmul.f32 %v4640_v4, %v4676_v32  ;;  %v640_v44 = vadd.f32 %v608_v46, %v444_v45  ;;  %v447_v5 = vadd.f32 %v4633_v1, %v411_v23 }
 0x11c   : > { %368 = vperm.xlu1 %3824, %v4817_v54   ;;  %v412_v8 = vmul.f32 %v4619_v59, %v4777_v47  ;;  %v807_v35 = vmul.f32 %v4763_v22, %v4741_v14  ;;  %v612_v15 = vmul.f32 %v4640_v4, %v4680_v34  ;;  %v414_v23 = vmul.f32 %v4619_v59, %v4794_v29 }
 0x11d   : > { %v1024_v40 = vadd.f32 %v992_v48, %v828_v42  ;;  %v998_v42 = vmul.f32 %v4780_v6, %v4704_v55  ;;  %v805_v48 = vmul.f32 %v4763_v22, %v4738_v58  ;;  %v1001_v58 = vmul.f32 %v4780_v6, %v4748_v53 }
 0x11e   : > { %v874_v43 = vpop.permute.xlu0 %873  ;;  %v642_v53 = vadd.f32 %v610_v50, %v446_v13  ;;  %v448_v14 = vadd.f32 %v4633_v1, %v412_v8 }
 0x11f   : > { %3893 = vtanh.f32 %v1024_v40  ;;  %v995_v30 = vmul.f32 %v4780_v6, %v874_v43  ;;  %v1030_v10 = vadd.f32 %v998_v42, %v834_v21  ;;  %v3892_v40 = vpop.eup %3891  ;;  %v837_v63 = vadd.f32 %v805_v48, %v641_v27 }
 0x120   : > { %373 = vperm.xlu1 %3824, %v4508_v28   ;;  %v4850_v38 = vpop.permute.xlu1 %521  ;;  %3895 = vtanh.f32 %v1026_v17  ;;  %v5521_v17 = vmov 1   ;;  %v1002_v43 = vmul.f32 %v4780_v6, %v4756_v24  ;;  %v838_v39 = vadd.f32 %v806_v7, %v642_v53 }
 0x121   : > { %v1027_v2 = vadd.f32 %v995_v30, %v831_v52  ;;  %v836_v52 = vadd.f32 %v804_v3, %v640_v44  ;;  %v1033_v30 = vadd.f32 %v1001_v58, %v837_v63  ;;  %v449_v24 = vadd.f32 %v4633_v1, %v4810_v11  ;;  %v5522_v3 = vld [vmem:[#allocation16_spill] sm:$0xff] }
 0x122   : > { %v878_v55 = vpop.permute.xlu0 %877  ;;  %v643_v21 = vadd.f32 %v611_v16, %v447_v5  ;;  %v1034_v47 = vadd.f32 %v1002_v43, %v838_v39  ;;  %v613_v34 = vmul.f32 %v4640_v4, %v4850_v38  ;;  %v615_v48 = vmul.f32 %v4640_v4, %v4685_v36 }
 0x123   : > { %3897 = vtanh.f32 %v1027_v2  ;;  %v996_v33 = vmul.f32 %v4780_v6, %v878_v55  ;;  %v415_v55 = vmul.f32 %v4619_v59, %v4826_v25  ;;  %v644_v50 = vadd.f32 %v612_v15, %v448_v14 }
 0x124   : > { %3825 = vset.pattern.permute.xlu1 %v5521_v17  ;;  %v4865_v18 = vpop.permute.xlu1 %525  ;;  %3899 = vtanh.f32 %v1029_v41  ;;  %v839_v61 = vadd.f32 %v807_v35, %v643_v21  ;;  %v809_v58 = vmul.f32 %v4763_v22, %v5522_v3 }
 0x125   : > { %v1028_v19 = vadd.f32 %v996_v33, %v832_v51  ;;  %569 = vperm.xlu1 %3825, %v4435_v12   ;;  %v451_v38 = vadd.f32 %v4633_v1, %v415_v55  ;;  %v614_v29 = vmul.f32 %v4640_v4, %v4865_v18  ;;  %v5525_v55 = vld [vmem:[#allocation2_spill] sm:$0xff] }
 0x126   : > { %v890_v56 = vpop.permute.xlu0 %889 }
 0x127   : > { %3901 = vtanh.f32 %v1028_v19  ;;  %v999_v0 = vmul.f32 %v4780_v6, %v890_v56  ;;  %v645_v56 = vadd.f32 %v613_v34, %v449_v24  ;;  %v647_v16 = vadd.f32 %v615_v48, %v451_v38 }
 0x128   : > { %3903 = vtanh.f32 %v1030_v10 }
 0x129   : > { %v3894_v57 = vpop.eup %3893  ;;  %v1031_v31 = vadd.f32 %v999_v0, %v835_v37  ;;  %573 = vperm.xlu1 %3825, %v4817_v54   ;;  %v714_v9 = vpop.permute.xlu1 %713  ;;  %v841_v43 = vadd.f32 %v809_v58, %v645_v56  ;;  %v5529_v56 = vld [vmem:[#allocation8_spill] sm:$0xff] }
 0x12a   : > { %v894_v32 = vpop.permute.xlu0 %893  ;;  %v1088_v20 = vpack.c.bf16 %v3892_v40, %v3894_v57  ;;  %v3896_v42 = vpop.eup %3895  ;;  %v808_v10 = vmul.f32 %v4763_v22, %v714_v9  ;;  %v450_v40 = vadd.f32 %v4633_v1, %v414_v23 }
 0x12b   : > { %3905 = vtanh.f32 %v1031_v31  ;;  %v1000_v60 = vmul.f32 %v4780_v6, %v894_v32 }
 0x12c   : > { %3451 = vmatprep.mubr.bf16.mxu0 %v1088_v20  ;;  %3907 = vtanh.f32 %v1033_v30  ;;  %v840_v13 = vadd.f32 %v808_v10, %v644_v50  ;;  %v646_v8 = vadd.f32 %v614_v29, %v450_v40  ;;  %v5530_v40 = vld [vmem:[#allocation9_spill] sm:$0xff] }
 0x12d   : > { %v3898_v2 = vpop.eup %3897  ;;  %v1032_v49 = vadd.f32 %v1000_v60, %v836_v52  ;;  %3826 = vset.pattern.permute.xlu1 %v5513_v62  ;;  %v722_v41 = vpop.permute.xlu1 %721 }
 0x12e   : > { %761 = vperm.xlu1 %3826, %v4501_v26   ;;  %v906_v11 = vpop.permute.xlu0 %905  ;;  %v1089_v51 = vpack.c.bf16 %v3898_v2, %v3896_v42  ;;  %v3900_v46 = vpop.eup %3899  ;;  %v810_v53 = vmul.f32 %v4763_v22, %v722_v41  ;;  %v5523_v42 = vmov 3  }
 0x12f   : > { %3909 = vtanh.f32 %v1032_v49  ;;  %v1003_v33 = vmul.f32 %v4780_v6, %v906_v11  ;;  %v5524_v49 = vmov 0  }
 0x130   : > { %3452 = vmatmul.mubr.bf16.vlgmr.msra.gmra.mrb[0].mxu0 %v1089_v51  ;;  %3911 = vtanh.f32 %v1034_v47  ;;  %v842_v60 = vadd.f32 %v810_v53, %v646_v8  ;;  %v4929_v51 = vld [vmem:[%s4396_s21 + $0xf0] sm:$0xff] }
 0x131   : > { %v3902_v45 = vpop.eup %3901  ;;  %v1035_v25 = vadd.f32 %v1003_v33, %v839_v61  ;;  %v726_v26 = vpop.permute.xlu1 %725 }
 0x132   : > { %v3904_v37 = vpop.eup %3903  ;;  %769 = vperm.xlu1 %3826, %v4817_v54   ;;  %v910_v19 = vpop.permute.xlu0 %909  ;;  %v1090_v27 = vpack.c.bf16 %v3900_v46, %v3902_v45  ;;  %v811_v7 = vmul.f32 %v4763_v22, %v726_v26  ;;  %v5527_v45 = vld [vmem:[#allocation3_spill] sm:$0xff]  ;;  %v5528_v26 = vld [vmem:[#allocation17_spill] sm:$0xff] }
 0x133   : > { %3913 = vtanh.f32 %v1035_v25  ;;  %v1004_v36 = vmul.f32 %v4780_v6, %v910_v19  ;;  %v4339_v19 = vld [vmem:[%s4396_s21 + $0xe8] sm:$0xff] }
 0x134   : > { %3455 = vmatprep.mubr.bf16.mxu0 %v1090_v27  ;;  %v843_v30 = vadd.f32 %v811_v7, %v647_v16  ;;  %v619_v16 = vmul.f32 %v4640_v4, %v5530_v40 }
 0x135   : > { %v3906_v0 = vpop.eup %3905  ;;  %v1036_v44 = vadd.f32 %v1004_v36, %v840_v13  ;;  %v616_v36 = vmul.f32 %v4640_v4, %v5529_v56 }
 0x136   : > { %773 = vperm.xlu1 %3826, %v4508_v28   ;;  %v914_v63 = vpop.permute.xlu1 %913  ;;  %v922_v57 = vpop.permute.xlu0 %921  ;;  %v1091_v5 = vpack.c.bf16 %v3906_v0, %v3904_v37  ;;  %v813_v37 = vmul.f32 %v4763_v22, %v5528_v26 }
 0x137   : > { %v1005_v31 = vmul.f32 %v4780_v6, %v914_v63  ;;  %v1007_v9 = vmul.f32 %v4780_v6, %v922_v57  ;;  %v3908_v52 = vpop.eup %3907  ;;  %3915 = vtanh.f32 %v1036_v44 }
 0x138   : > { %3456 = vmatmul.mubr.bf16.gmra.mrb[4].mxu0 %v1091_v5 }
 0x139   : > { %v3910_v18 = vpop.eup %3909  ;;  %v1037_v32 = vadd.f32 %v1005_v31, %v841_v43  ;;  %v1039_v20 = vadd.f32 %v1007_v9, %v843_v30 }
 0x13a   : > { %3827 = vset.pattern.permute.xlu1 %v5523_v42  ;;  %v918_v28 = vpop.permute.xlu1 %917  ;;  %v1092_v39 = vpack.c.bf16 %v3908_v52, %v3910_v18  ;;  %v3912_v35 = vpop.eup %3911 }
 0x13b   : > { %3917 = vtanh.f32 %v1037_v32  ;;  %v1006_v24 = vmul.f32 %v4780_v6, %v918_v28  ;;  %961 = vperm.xlu1 %3827, %v4435_v12   ;;  %v926_v29 = vpop.permute.xlu0 %925 }
 0x13c   : > { %3459 = vmatprep.mubr.bf16.mxu0 %v1092_v39  ;;  %3919 = vtanh.f32 %v1039_v20  ;;  %v1008_v53 = vmul.f32 %v4780_v6, %v926_v29 }
 0x13d   : > { %v3914_v2 = vpop.eup %3913  ;;  %v1038_v15 = vadd.f32 %v1006_v24, %v842_v60 }
 0x13e   : > { %v1093_v21 = vpack.c.bf16 %v3914_v2, %v3912_v35 }
 0x13f   : > { %3921 = vtanh.f32 %v1038_v15  ;;  %965 = vperm.xlu1 %3827, %v4817_v54   ;;  %v319_v47 = vpop.permute.xlu1 %318  ;;  %v5526_v54 = vld [vmem:[#allocation4_spill] sm:$0xff]  ;;  %v938_v31 = vpop.permute.xlu0 %937 }
 0x140   : > { %3460 = vmatmul.mubr.bf16.gmra.mrb[8].mxu0 %v1093_v21  ;;  %v417_v46 = vmul.f32 %v4619_v59, %v5526_v54  ;;  %v416_v3 = vmul.f32 %v4619_v59, %v319_v47  ;;  %v1011_v8 = vmul.f32 %v4780_v6, %v938_v31 }
 0x141   : > { %v3916_v14 = vpop.eup %3915 }
 0x142   : > { %v453_v25 = vadd.f32 %v4633_v1, %v417_v46  ;;  %v452_v13 = vadd.f32 %v4633_v1, %v416_v3  ;;  %v3846_v3 = vld [vmem:[%s5484_s2 + $0x58] sm:$0xff]  }
 0x143   : > { %3828 = vset.pattern.permute.xlu1 %v5524_v49  ;;  %v329_v41 = vpop.permute.xlu1 %328  ;;  %v942_v29 = vpop.permute.xlu0 %941 }
 0x144   : > { %378 = vperm.xlu1 %3828, %v5525_v55   ;;  %v648_v63 = vadd.f32 %v616_v36, %v452_v13  ;;  %v5533_v13 = vld [vmem:[#allocation10_spill] sm:$0xff] }
 0x145   : > { %v3918_v11 = vpop.eup %3917 }
 0x146   : > { %v1094_v12 = vpack.c.bf16 %v3918_v11, %v3916_v14  ;;  %v3920_v34 = vpop.eup %3919  ;;  %v3843_v14 = vld [vmem:[%s5484_s2 + $0x40] sm:$0xff]  }
 0x147   : > { %v334_v61 = vpop.permute.xlu1 %333  ;;  %3483 = vmatprep.subr.bf16.mxu1 %v3843_v14 }
 0x148   : > { %388 = vperm.xlu1 %3828, %v4929_v51   ;;  %3463 = vmatprep.mubr.bf16.mxu0 %v1094_v12  ;;  %v419_v7 = vmul.f32 %v4619_v59, %v334_v61 }
 0x149   : > { %v3922_v33 = vpop.eup %3921 }
 0x14a   : > { %v1095_v10 = vpack.c.bf16 %v3920_v34, %v3922_v33  ;;  %v455_v44 = vadd.f32 %v4633_v1, %v419_v7  ;;  %v5531_v33 = vld [vmem:[#allocation5_spill] sm:$0xff]  ;;  %v620_v7 = vmul.f32 %v4640_v4, %v5533_v13 }
 0x14b   : > { %v421_v54 = vmul.f32 %v4619_v59, %v5531_v33 }
 0x14c   : > { %393 = vperm.xlu1 %3828, %v5527_v45   ;;  %v538_v48 = vpop.permute.xlu1 %537  ;;  %3464 = vmatmul.mubr.bf16.gmra.mrb[12].mxu0 %v1095_v10  ;;  %v651_v9 = vadd.f32 %v619_v16, %v455_v44 }
 0x14d   : > { %v617_v23 = vmul.f32 %v4640_v4, %v538_v48  ;;  %v5532_v48 = vld [vmem:[#allocation18_spill] sm:$0xff] }
 0x14f   : > { %v649_v38 = vadd.f32 %v617_v23, %v453_v25  ;;  %v817_v25 = vmul.f32 %v4763_v22, %v5532_v48 }
 0x150   : > { %3830 = vset.pattern.permute.xlu1 %v5521_v17  ;;  %v542_v50 = vpop.permute.xlu1 %541 }
 0x151   : > { %585 = vperm.xlu1 %3830, %v4339_v19   ;;  %v845_v27 = vadd.f32 %v813_v37, %v649_v38  ;;  %v618_v52 = vmul.f32 %v4640_v4, %v542_v50  ;;  %v3845_v38 = vld [vmem:[%s5484_s2 + $0x50] sm:$0xff]  }
 0x155   : > { %589 = vperm.xlu1 %3830, %v4929_v51   ;;  %v730_v58 = vpop.permute.xlu1 %729 }
 0x156   : > { %v812_v17 = vmul.f32 %v4763_v22, %v730_v58 }
 0x158   : > { %v844_v5 = vadd.f32 %v812_v17, %v648_v63  ;;  %v3847_v17 = vld [vmem:[%s5484_s2 + $0x60] sm:$0xff]   ;;  %v5534_v63 = vld [vmem:[#allocation11_spill] sm:$0xff] }
 0x159   : > { %3832 = vset.pattern.permute.xlu1 %v5513_v62  ;;  %v738_v0 = vpop.permute.xlu1 %737  ;;  %v418_v62 = vmul.f32 %v4619_v59, %v329_v41 }
 0x15a   : > { %777 = vperm.xlu1 %3832, %v5525_v55   ;;  %v1040_v30 = vadd.f32 %v1008_v53, %v844_v5  ;;  %v814_v28 = vmul.f32 %v4763_v22, %v738_v0  ;;  %v1012_v53 = vmul.f32 %v4780_v6, %v942_v29 }
 0x15b   : > { %v454_v20 = vadd.f32 %v4633_v1, %v418_v62  ;;  %v3848_v62 = vld [vmem:[%s5484_s2 + $0x68] sm:$0xff]  }
 0x15c   : > { %3923 = vtanh.f32 %v1040_v30 }
 0x15d   : > { %v742_v57 = vpop.permute.xlu1 %741  ;;  %v650_v35 = vadd.f32 %v618_v52, %v454_v20 }
 0x15e   : > { %v815_v43 = vmul.f32 %v4763_v22, %v742_v57  ;;  %785 = vperm.xlu1 %3832, %v4929_v51   ;;  %v623_v57 = vmul.f32 %v4640_v4, %v5534_v63 }
 0x15f   : > { %v846_v15 = vadd.f32 %v814_v28, %v650_v35  ;;  %v3849_v28 = vld [vmem:[%s5484_s2 + $0x70] sm:$0xff]  }
 0x160   : > { %v847_v18 = vadd.f32 %v815_v43, %v651_v9  ;;  %v954_v9 = vpop.permute.xlu0 %953 }
 0x162   : > { %789 = vperm.xlu1 %3832, %v5527_v45   ;;  %v930_v32 = vpop.permute.xlu1 %929  ;;  %v1043_v24 = vadd.f32 %v1011_v8, %v847_v18  ;;  %v457_v45 = vadd.f32 %v4633_v1, %v421_v54 }
 0x163   : > { %v1009_v39 = vmul.f32 %v4780_v6, %v930_v32  ;;  %v1015_v32 = vmul.f32 %v4780_v6, %v954_v9 }
 0x164   : > { %v958_v29 = vpop.permute.xlu0 %957 }
 0x165   : > { %v1041_v60 = vadd.f32 %v1009_v39, %v845_v27  ;;  %v1016_v63 = vmul.f32 %v4780_v6, %v958_v29 }
 0x166   : > { %3834 = vset.pattern.permute.xlu1 %v5523_v42  ;;  %v934_v2 = vpop.permute.xlu1 %933  ;;  %v3924_v55 = vpop.eup %3923 }
 0x167   : > { %3925 = vtanh.f32 %v1041_v60  ;;  %v1010_v21 = vmul.f32 %v4780_v6, %v934_v2  ;;  %977 = vperm.xlu1 %3834, %v4339_v19  }
 0x168   : > { %3927 = vtanh.f32 %v1043_v24 }
 0x169   : > { %v1042_v47 = vadd.f32 %v1010_v21, %v846_v15 }
 0x16b   : > { %3929 = vtanh.f32 %v1042_v47  ;;  %981 = vperm.xlu1 %3834, %v4929_v51   ;;  %v339_v49 = vpop.permute.xlu1 %338  ;;  %v3844_v51 = vld [vmem:[%s5484_s2 + $0x48] sm:$0xff]   ;;  %v3850_v47 = vld [vmem:[%s5484_s2 + $0x78] sm:$0xff]  }
 0x16c   : > { %v420_v19 = vmul.f32 %v4619_v59, %v339_v49 }
 0x16e   : > { %v456_v58 = vadd.f32 %v4633_v1, %v420_v19 }
 0x16f   : > { %v349_v41 = vpop.permute.xlu1 %348 }
 0x170   : > { %v652_v16 = vadd.f32 %v620_v7, %v456_v58  ;;  %v422_v31 = vmul.f32 %v4619_v59, %v349_v41 }
 0x171   : > { %v3926_v11 = vpop.eup %3925 }
 0x172   : > { %v1096_v42 = vpack.c.bf16 %v3926_v11, %v3924_v55  ;;  %v3928_v61 = vpop.eup %3927  ;;  %v458_v39 = vadd.f32 %v4633_v1, %v422_v31 }
 0x173   : > { %v354_v12 = vpop.permute.xlu1 %353 }
 0x174   : > { %3467 = vmatprep.mubr.bf16.mxu1 %v1096_v42  ;;  %v423_v56 = vmul.f32 %v4619_v59, %v354_v12 }
 0x175   : > { %v3930_v34 = vpop.eup %3929 }
 0x176   : > { %v1097_v46 = vpack.c.bf16 %v3928_v61, %v3930_v34  ;;  %v459_v40 = vadd.f32 %v4633_v1, %v423_v56 }
 0x178   : > { %v554_v10 = vpop.permute.xlu1 %553  ;;  %3468 = vmatmul.mubr.bf16.vlgmr.msra.gmra.mrb[0].mxu1 %v1097_v46  ;;  %v655_v52 = vadd.f32 %v623_v57, %v459_v40  ;;  %v5535_v46 = vld [vmem:[#allocation6_spill] sm:$0xff] }
 0x179   : > { %v621_v26 = vmul.f32 %v4640_v4, %v554_v10  ;;  %3484 = vmatpush3.bf16.msra.mxu1 %v3843_v14  ;;  %v425_v10 = vmul.f32 %v4619_v59, %v5535_v46 }
 0x17a   : > { %3485 = vmatprep.subr.bf16.mxu1 %v3844_v51 }
 0x17b   : > { %v653_v37 = vadd.f32 %v621_v26, %v457_v45  ;;  %v461_v48 = vadd.f32 %v4633_v1, %v425_v10  ;;  %v5536_v26 = vld [vmem:[#allocation19_spill] sm:$0xff]  ;;  %v5540_v10 = vld [vmem:[#allocation20_spill] sm:$0xff] }
 0x17c   : > { %v558_v23 = vpop.permute.xlu1 %557 }
 0x17d   : > { %v849_v50 = vadd.f32 %v817_v25, %v653_v37  ;;  %3486 = vmatpush3.bf16.msra.mxu1 %v3844_v51  ;;  %v622_v30 = vmul.f32 %v4640_v4, %v558_v23  ;;  %v821_v37 = vmul.f32 %v4763_v22, %v5536_v26 }
 0x17e   : > { %3487 = vmatprep.subr.bf16.mxu1 %v3845_v38 }
 0x17f   : > { %v654_v24 = vadd.f32 %v622_v30, %v458_v39 }
 0x181   : > { %v746_v27 = vpop.permute.xlu1 %745  ;;  %3488 = vmatpush3.bf16.msra.mxu1 %v3845_v38 }
 0x182   : > { %3489 = vmatprep.subr.bf16.mxu1 %v3846_v3  ;;  %v816_v0 = vmul.f32 %v4763_v22, %v746_v27 }
 0x184   : > { %v848_v5 = vadd.f32 %v816_v0, %v652_v16  ;;  %v5538_v16 = vld [vmem:[#allocation13_spill] sm:$0xff] }
 0x185   : > { %v754_v36 = vpop.permute.xlu1 %753  ;;  %3490 = vmatpush3.bf16.msra.mxu1 %v3846_v3 }
 0x186   : > { %3491 = vmatprep.subr.bf16.mxu1 %v3847_v17  ;;  %v1044_v18 = vadd.f32 %v1012_v53, %v848_v5  ;;  %v818_v35 = vmul.f32 %v4763_v22, %v754_v36  ;;  %v5537_v36 = vld [vmem:[#allocation12_spill] sm:$0xff] }
 0x187   : > { %v624_v13 = vmul.f32 %v4640_v4, %v5537_v36 }
 0x188   : > { %3931 = vtanh.f32 %v1044_v18  ;;  %v850_v49 = vadd.f32 %v818_v35, %v654_v24  ;;  %v970_v18 = vpop.permute.xlu0 %969 }
 0x189   : > { %v758_v44 = vpop.permute.xlu1 %757  ;;  %3492 = vmatpush3.bf16.msra.mxu1 %v3847_v17 }
 0x18a   : > { %v819_v43 = vmul.f32 %v4763_v22, %v758_v44  ;;  %3493 = vmatprep.subr.bf16.mxu1 %v3848_v62  ;;  %v627_v44 = vmul.f32 %v4640_v4, %v5538_v16 }
 0x18c   : > { %v851_v8 = vadd.f32 %v819_v43, %v655_v52 }
 0x18d   : > { %3494 = vmatpush3.bf16.msra.mxu1 %v3848_v62 }
 0x18e   : > { %v946_v20 = vpop.permute.xlu1 %945  ;;  %3495 = vmatprep.subr.bf16.mxu1 %v3849_v28  ;;  %v1047_v15 = vadd.f32 %v1015_v32, %v851_v8 }
 0x18f   : > { %v1013_v60 = vmul.f32 %v4780_v6, %v946_v20  ;;  %v1019_v20 = vmul.f32 %v4780_v6, %v970_v18 }
 0x191   : > { %v1045_v2 = vadd.f32 %v1013_v60, %v849_v50  ;;  %3496 = vmatpush3.bf16.msra.mxu1 %v3849_v28 }
 0x192   : > { %v950_v21 = vpop.permute.xlu1 %949  ;;  %3497 = vmatprep.subr.bf16.mxu1 %v3850_v47  ;;  %v3932_v42 = vpop.eup %3931 }
 0x193   : > { %3933 = vtanh.f32 %v1045_v2  ;;  %v1014_v41 = vmul.f32 %v4780_v6, %v950_v21 }
 0x194   : > { %3935 = vtanh.f32 %v1047_v15 }
 0x195   : > { %v1046_v14 = vadd.f32 %v1014_v41, %v850_v49  ;;  %3498 = vmatpush3.bf16.msra.mxu1 %v3850_v47 }
 0x197   : > { %3937 = vtanh.f32 %v1046_v14  ;;  %v359_v55 = vpop.permute.xlu1 %358 }
 0x198   : > { %v424_v19 = vmul.f32 %v4619_v59, %v359_v55 }
 0x19a   : > { %v460_v3 = vadd.f32 %v4633_v1, %v424_v19  ;;  %v5541_v19 = vld [vmem:[#allocation14_spill] sm:$0xff] }
 0x19b   : > { %v369_v11 = vpop.permute.xlu1 %368 }
 0x19c   : > { %v656_v17 = vadd.f32 %v624_v13, %v460_v3  ;;  %v426_v53 = vmul.f32 %v4619_v59, %v369_v11 }
 0x19d   : > { %v3934_v12 = vpop.eup %3933 }
 0x19e   : > { %v1098_v61 = vpack.c.bf16 %v3934_v12, %v3932_v42  ;;  %v3936_v33 = vpop.eup %3935  ;;  %v462_v30 = vadd.f32 %v4633_v1, %v426_v53  ;;  %v5539_v42 = vld [vmem:[#allocation7_spill] sm:$0xff] }
 0x19f   : > { %v374_v34 = vpop.permute.xlu1 %373  ;;  %v429_v12 = vmul.f32 %v4619_v59, %v5539_v42 }
 0x1a0   : > { %3471 = vmatprep.mubr.bf16.mxu1 %v1098_v61  ;;  %v427_v58 = vmul.f32 %v4619_v59, %v374_v34 }
 0x1a1   : > { %v3938_v54 = vpop.eup %3937 }
 0x1a2   : > { %v1099_v51 = vpack.c.bf16 %v3936_v33, %v3938_v54  ;;  %v463_v0 = vadd.f32 %v4633_v1, %v427_v58  ;;  %v4340_v33 = vld [vmem:[%s5485_s3] ss:$0 sm:$0xff]  ;;  %v974_v58 = vpop.permute.xlu0 %973 }
 0x1a3   : > { %v465_v54 = vadd.f32 %v4340_v33, %v429_v12  ;;  %v1020_v16 = vmul.f32 %v4780_v6, %v974_v58 }
 0x1a4   : > { %v570_v45 = vpop.permute.xlu1 %569  ;;  %3472 = vmatmul.mubr.bf16.gmra.mrb[4].mxu1 %v1099_v51  ;;  %v659_v43 = vadd.f32 %v627_v44, %v463_v0  ;;  %v825_v51 = vmul.f32 %v4763_v22, %v5540_v10 }
 0x1a5   : > { %v625_v25 = vmul.f32 %v4640_v4, %v570_v45 }
 0x1a7   : > { %v657_v23 = vadd.f32 %v625_v25, %v461_v48 }
 0x1a8   : > { %v574_v38 = vpop.permute.xlu1 %573 }
 0x1a9   : > { %v853_v50 = vadd.f32 %v821_v37, %v657_v23  ;;  %v626_v62 = vmul.f32 %v4640_v4, %v574_v38 }
 0x1ab   : > { %v658_v28 = vadd.f32 %v626_v62, %v462_v30 }
 0x1ad   : > { %v762_v27 = vpop.permute.xlu1 %761 }
 0x1ae   : > { %v820_v7 = vmul.f32 %v4763_v22, %v762_v27  ;;  %v628_v27 = vmul.f32 %v4640_v4, %v5541_v19 }
 0x1b0   : > { %v852_v57 = vadd.f32 %v820_v7, %v656_v17  ;;  %v5542_v7 = vld [vmem:[#allocation15_spill] sm:$0xff] }
 0x1b1   : > { %v770_v56 = vpop.permute.xlu1 %769  ;;  %v631_v0 = vmul.f32 %v4640_v4, %v5542_v7 }
 0x1b2   : > { %v1048_v31 = vadd.f32 %v1016_v63, %v852_v57  ;;  %v822_v8 = vmul.f32 %v4763_v22, %v770_v56  ;;  %v986_v63 = vpop.permute.xlu0 %985 }
 0x1b4   : > { %3939 = vtanh.f32 %v1048_v31  ;;  %v854_v24 = vadd.f32 %v822_v8, %v658_v28 }
 0x1b5   : > { %v774_v40 = vpop.permute.xlu1 %773 }
 0x1b6   : > { %v823_v5 = vmul.f32 %v4763_v22, %v774_v40 }
 0x1b8   : > { %v855_v9 = vadd.f32 %v823_v5, %v659_v43 }
 0x1ba   : > { %v962_v52 = vpop.permute.xlu1 %961  ;;  %v1051_v35 = vadd.f32 %v1019_v20, %v855_v9 }
 0x1bb   : > { %v1017_v32 = vmul.f32 %v4780_v6, %v962_v52  ;;  %v1023_v52 = vmul.f32 %v4780_v6, %v986_v63 }
 0x1bd   : > { %v1049_v39 = vadd.f32 %v1017_v32, %v853_v50 }
 0x1be   : > { %v966_v60 = vpop.permute.xlu1 %965  ;;  %v3940_v47 = vpop.eup %3939 }
 0x1bf   : > { %3941 = vtanh.f32 %v1049_v39  ;;  %v1018_v2 = vmul.f32 %v4780_v6, %v966_v60 }
 0x1c0   : > { %3943 = vtanh.f32 %v1051_v35 }
 0x1c1   : > { %v1050_v15 = vadd.f32 %v1018_v2, %v854_v24  ;;  %v5064_v2 = vld [vmem:[%s5485_s3 + $0x1] ss:$0 sm:$0xff] }
 0x1c3   : > { %3945 = vtanh.f32 %v1050_v15  ;;  %v379_v1 = vpop.permute.xlu1 %378 }
 0x1c4   : > { %v428_v26 = vmul.f32 %v4619_v59, %v379_v1 }
 0x1c6   : > { %v464_v23 = vadd.f32 %v4340_v33, %v428_v26 }
 0x1c7   : > { %v389_v21 = vpop.permute.xlu1 %388 }
 0x1c8   : > { %v660_v36 = vadd.f32 %v628_v27, %v464_v23  ;;  %v430_v40 = vmul.f32 %v4619_v59, %v389_v21 }
 0x1c9   : > { %v3942_v49 = vpop.eup %3941 }
 0x1ca   : > { %v1100_v41 = vpack.c.bf16 %v3942_v49, %v3940_v47  ;;  %v3944_v55 = vpop.eup %3943  ;;  %v466_v62 = vadd.f32 %v4340_v33, %v430_v40 }
 0x1cb   : > { %v394_v14 = vpop.permute.xlu1 %393 }
 0x1cc   : > { %3475 = vmatprep.mubr.bf16.mxu1 %v1100_v41  ;;  %v431_v38 = vmul.f32 %v4619_v59, %v394_v14 }
 0x1cd   : > { %v3946_v11 = vpop.eup %3945 }
 0x1ce   : > { %v1101_v61 = vpack.c.bf16 %v3944_v55, %v3946_v11  ;;  %v467_v56 = vadd.f32 %v4340_v33, %v431_v38 }
 0x1d0   : > { %v586_v34 = vpop.permute.xlu1 %585  ;;  %3476 = vmatmul.mubr.bf16.gmra.mrb[8].mxu1 %v1101_v61  ;;  %v663_v44 = vadd.f32 %v631_v0, %v467_v56 }
 0x1d1   : > { %v629_v46 = vmul.f32 %v4640_v4, %v586_v34 }
 0x1d3   : > { %v661_v45 = vadd.f32 %v629_v46, %v465_v54 }
 0x1d4   : > { %v590_v48 = vpop.permute.xlu1 %589 }
 0x1d5   : > { %v857_v25 = vadd.f32 %v825_v51, %v661_v45  ;;  %v630_v57 = vmul.f32 %v4640_v4, %v590_v48 }
 0x1d7   : > { %v662_v30 = vadd.f32 %v630_v57, %v466_v62 }
 0x1d9   : > { %v778_v37 = vpop.permute.xlu1 %777 }
 0x1da   : > { %v824_v3 = vmul.f32 %v4763_v22, %v778_v37 }
 0x1dc   : > { %v856_v17 = vadd.f32 %v824_v3, %v660_v36 }
 0x1dd   : > { %v786_v50 = vpop.permute.xlu1 %785 }
 0x1de   : > { %v1052_v5 = vadd.f32 %v1020_v16, %v856_v17  ;;  %v826_v31 = vmul.f32 %v4763_v22, %v786_v50 }
 0x1e0   : > { %3947 = vtanh.f32 %v1052_v5  ;;  %v858_v32 = vadd.f32 %v826_v31, %v662_v30 }
 0x1e1   : > { %v790_v13 = vpop.permute.xlu1 %789 }
 0x1e2   : > { %v827_v29 = vmul.f32 %v4763_v22, %v790_v13 }
 0x1e4   : > { %v859_v53 = vadd.f32 %v827_v29, %v663_v44 }
 0x1e6   : > { %v978_v43 = vpop.permute.xlu1 %977  ;;  %v1055_v59 = vadd.f32 %v1023_v52, %v859_v53 }
 0x1e7   : > { %v1021_v9 = vmul.f32 %v4780_v6, %v978_v43 }
 0x1e9   : > { %v1053_v18 = vadd.f32 %v1021_v9, %v857_v25 }
 0x1ea   : > { %v982_v8 = vpop.permute.xlu1 %981  ;;  %v3948_v28 = vpop.eup %3947 }
 0x1eb   : > { %3949 = vtanh.f32 %v1053_v18  ;;  %v1022_v20 = vmul.f32 %v4780_v6, %v982_v8 }
 0x1ec   : > { %3951 = vtanh.f32 %v1055_v59 }
 0x1ed   : > { %v1054_v4 = vadd.f32 %v1022_v20, %v858_v32 }
 0x1ef   : > { %3953 = vtanh.f32 %v1054_v4 }
 0x1f5   : > { %v3950_v39 = vpop.eup %3949 }
 0x1f6   : > { %v1102_v35 = vpack.c.bf16 %v3950_v39, %v3948_v28  ;;  %v3952_v22 = vpop.eup %3951 }
 0x1f8   : > { %3479 = vmatprep.mubr.bf16.mxu1 %v1102_v35 }
 0x1f9   : > { %v3954_v60 = vpop.eup %3953 }
 0x1fa   : > { %v1103_v24 = vpack.c.bf16 %v3952_v22, %v3954_v60 }
 0x1fc   : > { %3480 = vmatmul.mubr.bf16.gmra.mrb[12].mxu1 %v1103_v24 }
 0x203   : > { %v3453_v15 = vpop.f32.mrb[0].mxu0 }
 0x204   : > { %v1216_v1 = vadd.f32 %v3453_v15, %v5064_v2  ;;  %v1207_v6 = vpop.f32.mrb[1].mxu0 }
 0x205   : > { %v1208_v21 = vadd.f32 %v5064_v2, %v1207_v6  ;;  %v3454_v47 = vpop.f32.mrb[2].mxu0 }
 0x206   : > { %3955 = vtanh.f32 %v1216_v1  ;;  %v1219_v49 = vadd.f32 %v3454_v47, %v5064_v2  ;;  %v1210_v41 = vpop.f32.mrb[3].mxu0  ;;  %v3851_v1 = vld [vmem:[%s5484_s2 + $0x80] sm:$0xff]  }
 0x207   : > { %3957 = vtanh.f32 %v1208_v21  ;;  %v1211_v14 = vadd.f32 %v5064_v2, %v1210_v41  ;;  %3531 = vmatprep.subr.bf16.mxu0 %v3851_v1 }
 0x208   : > { %3959 = vtanh.f32 %v1219_v49  ;;  %3532 = vmatpush3.bf16.msra.mxu0 %v3851_v1 }
 0x209   : > { %3961 = vtanh.f32 %v1211_v14 }
 0x20b   : > { %v3457_v55 = vpop.f32.mrb[4].mxu0 }
 0x20c   : > { %v1232_v11 = vadd.f32 %v3457_v55, %v5064_v2  ;;  %v1223_v42 = vpop.f32.mrb[5].mxu0  ;;  %v3852_v55 = vld [vmem:[%s5484_s2 + $0x88] sm:$0xff]  }
 0x20d   : > { %v1224_v12 = vadd.f32 %v5064_v2, %v1223_v42  ;;  %v3458_v61 = vpop.f32.mrb[6].mxu0  ;;  %3533 = vmatprep.subr.bf16.mxu0 %v3852_v55  ;;  %v3854_v42 = vld [vmem:[%s5484_s2 + $0x98] sm:$0xff]  }
 0x20e   : > { %3963 = vtanh.f32 %v1232_v11  ;;  %v1235_v34 = vadd.f32 %v3458_v61, %v5064_v2  ;;  %v1226_v33 = vpop.f32.mrb[7].mxu0  ;;  %v3853_v11 = vld [vmem:[%s5484_s2 + $0x90] sm:$0xff]   ;;  %3534 = vmatpush3.bf16.msra.mxu0 %v3852_v55  ;;  %v3856_v61 = vld [vmem:[%s5484_s2 + $0xa8] sm:$0xff]  }
 0x20f   : > { %3965 = vtanh.f32 %v1224_v12  ;;  %v1227_v54 = vadd.f32 %v5064_v2, %v1226_v33  ;;  %3535 = vmatprep.subr.bf16.mxu0 %v3853_v11  ;;  %v3855_v12 = vld [vmem:[%s5484_s2 + $0xa0] sm:$0xff]  }
 0x210   : > { %v3956_v46 = vpop.eup %3955  ;;  %3967 = vtanh.f32 %v1235_v34  ;;  %v3857_v34 = vld [vmem:[%s5484_s2 + $0xb0] sm:$0xff]  }
 0x211   : > { %v3958_v10 = vpop.eup %3957  ;;  %3969 = vtanh.f32 %v1227_v54 }
 0x212   : > { %v3960_v51 = vpop.eup %3959  ;;  %3536 = vmatpush3.bf16.msra.mxu0 %v3853_v11 }
 0x213   : > { %v3962_v45 = vpop.eup %3961  ;;  %v3461_v48 = vpop.f32.mrb[8].mxu0  ;;  %v1367_v25 = vpack.c.bf16 %v3960_v51, %v3956_v46  ;;  %3537 = vmatprep.subr.bf16.mxu0 %v3854_v42 }
 0x214   : > { %v1248_v26 = vadd.f32 %v3461_v48, %v5064_v2  ;;  %v1239_v37 = vpop.f32.mrb[9].mxu0  ;;  %v1366_v23 = vpack.c.bf16 %v3962_v45, %v3958_v10  ;;  %v3858_v45 = vld [vmem:[%s5484_s2 + $0xb8] sm:$0xff]  }
 0x215   : > { %v1240_v38 = vadd.f32 %v5064_v2, %v1239_v37  ;;  %v3462_v50 = vpop.f32.mrb[10].mxu0 }
 0x216   : > { %3971 = vtanh.f32 %v1248_v26  ;;  %v1251_v19 = vadd.f32 %v3462_v50, %v5064_v2  ;;  %v1242_v27 = vpop.f32.mrb[11].mxu0  ;;  %3499 = vmatprep.mubr.bf16.mxu1 %v1366_v23  ;;  %3538 = vmatpush3.bf16.msra.mxu0 %v3854_v42 }
 0x217   : > { %3973 = vtanh.f32 %v1240_v38  ;;  %v1243_v3 = vadd.f32 %v5064_v2, %v1242_v27  ;;  %3500 = vmatmul.mubr.bf16.vlgmr.msra.gmra.mrb[16].mxu1 %v1367_v25  ;;  %3539 = vmatprep.subr.bf16.mxu0 %v3855_v12 }
 0x218   : > { %v3964_v58 = vpop.eup %3963  ;;  %3975 = vtanh.f32 %v1251_v19 }
 0x219   : > { %v3966_v56 = vpop.eup %3965  ;;  %3977 = vtanh.f32 %v1243_v3 }
 0x21a   : > { %v3968_v36 = vpop.eup %3967  ;;  %3540 = vmatpush3.bf16.msra.mxu0 %v3855_v12 }
 0x21b   : > { %v3970_v13 = vpop.eup %3969  ;;  %v1369_v7 = vpack.c.bf16 %v3968_v36, %v3964_v58  ;;  %3541 = vmatprep.subr.bf16.mxu0 %v3856_v61 }
 0x21c   : > { %v1368_v0 = vpack.c.bf16 %v3970_v13, %v3966_v56 }
 0x21e   : > { %3503 = vmatprep.mubr.bf16.mxu1 %v1368_v0  ;;  %3542 = vmatpush3.bf16.msra.mxu0 %v3856_v61 }
 0x21f   : > { %v3465_v17 = vpop.f32.mrb[12].mxu0  ;;  %3504 = vmatmul.mubr.bf16.gmra.mrb[20].mxu1 %v1369_v7  ;;  %3543 = vmatprep.subr.bf16.mxu0 %v3857_v34 }
 0x220   : > { %v3972_v29 = vpop.eup %3971  ;;  %v1264_v40 = vadd.f32 %v3465_v17, %v5064_v2  ;;  %v1255_v16 = vpop.f32.mrb[13].mxu0 }
 0x221   : > { %v3974_v44 = vpop.eup %3973  ;;  %v1256_v63 = vadd.f32 %v5064_v2, %v1255_v16  ;;  %v3466_v57 = vpop.f32.mrb[14].mxu0 }
 0x222   : > { %v3976_v5 = vpop.eup %3975  ;;  %3979 = vtanh.f32 %v1264_v40  ;;  %v1267_v53 = vadd.f32 %v3466_v57, %v5064_v2  ;;  %v1258_v43 = vpop.f32.mrb[15].mxu0  ;;  %3544 = vmatpush3.bf16.msra.mxu0 %v3857_v34 }
 0x223   : > { %v3978_v62 = vpop.eup %3977  ;;  %3981 = vtanh.f32 %v1256_v63  ;;  %v1259_v31 = vadd.f32 %v5064_v2, %v1258_v43  ;;  %v1371_v9 = vpack.c.bf16 %v3976_v5, %v3972_v29  ;;  %3545 = vmatprep.subr.bf16.mxu0 %v3858_v45 }
 0x224   : > { %3983 = vtanh.f32 %v1267_v53  ;;  %v1370_v52 = vpack.c.bf16 %v3978_v62, %v3974_v44 }
 0x225   : > { %3985 = vtanh.f32 %v1259_v31 }
 0x226   : > { %3507 = vmatprep.mubr.bf16.mxu1 %v1370_v52  ;;  %3546 = vmatpush3.bf16.msra.mxu0 %v3858_v45 }
 0x227   : > { %3508 = vmatmul.mubr.bf16.gmra.mrb[24].mxu1 %v1371_v9 }
 0x22c   : > { %v3980_v30 = vpop.eup %3979 }
 0x22d   : > { %v3982_v18 = vpop.eup %3981 }
 0x22e   : > { %v3984_v59 = vpop.eup %3983 }
 0x22f   : > { %v3986_v8 = vpop.eup %3985  ;;  %v1373_v32 = vpack.c.bf16 %v3984_v59, %v3980_v30 }
 0x230   : > { %v1372_v20 = vpack.c.bf16 %v3986_v8, %v3982_v18 }
 0x232   : > { %3511 = vmatprep.mubr.bf16.mxu1 %v1372_v20 }
 0x233   : > { %3512 = vmatmul.mubr.bf16.gmra.mrb[28].mxu1 %v1373_v32 }
 0x24b   : > { %v3469_v4 = vpop.f32.mrb[0].mxu1 }
 0x24c   : > { %v1280_v28 = vadd.f32 %v3469_v4, %v5064_v2  ;;  %v1271_v39 = vpop.f32.mrb[1].mxu1 }
 0x24d   : > { %v1272_v35 = vadd.f32 %v5064_v2, %v1271_v39  ;;  %v3470_v22 = vpop.f32.mrb[2].mxu1 }
 0x24e   : > { %3987 = vtanh.f32 %v1280_v28  ;;  %v1283_v60 = vadd.f32 %v3470_v22, %v5064_v2  ;;  %v1274_v24 = vpop.f32.mrb[3].mxu1  ;;  %v5125_v28 = vld [vmem:[%s5485_s3 + $0x2] ss:$0 sm:$0xff] }
 0x24f   : > { %3989 = vtanh.f32 %v1272_v35  ;;  %v1275_v15 = vadd.f32 %v5064_v2, %v1274_v24 }
 0x250   : > { %3991 = vtanh.f32 %v1283_v60 }
 0x251   : > { %3993 = vtanh.f32 %v1275_v15 }
 0x258   : > { %v3988_v6 = vpop.eup %3987 }
 0x259   : > { %v3990_v21 = vpop.eup %3989 }
 0x25a   : > { %v3992_v47 = vpop.eup %3991 }
 0x25b   : > { %v3994_v49 = vpop.eup %3993  ;;  %v1375_v41 = vpack.c.bf16 %v3992_v47, %v3988_v6 }
 0x25c   : > { %v1374_v14 = vpack.c.bf16 %v3994_v49, %v3990_v21 }
 0x25e   : > { %3515 = vmatprep.mubr.bf16.mxu1 %v1374_v14 }
 0x25f   : > { %3516 = vmatmul.mubr.bf16.gmra.mrb[32].mxu1 %v1375_v41 }
 0x277   : > { %v3473_v33 = vpop.f32.mrb[4].mxu1 }
 0x278   : > { %v1296_v54 = vadd.f32 %v3473_v33, %v5064_v2  ;;  %v1287_v46 = vpop.f32.mrb[5].mxu1 }
 0x279   : > { %v1288_v10 = vadd.f32 %v5064_v2, %v1287_v46  ;;  %v3474_v51 = vpop.f32.mrb[6].mxu1 }
 0x27a   : > { %3995 = vtanh.f32 %v1296_v54  ;;  %v1299_v48 = vadd.f32 %v3474_v51, %v5064_v2  ;;  %v1290_v25 = vpop.f32.mrb[7].mxu1 }
 0x27b   : > { %3997 = vtanh.f32 %v1288_v10  ;;  %v1291_v26 = vadd.f32 %v5064_v2, %v1290_v25 }
 0x27c   : > { %3999 = vtanh.f32 %v1299_v48 }
 0x27d   : > { %4001 = vtanh.f32 %v1291_v26 }
 0x284   : > { %v3996_v37 = vpop.eup %3995 }
 0x285   : > { %v3998_v23 = vpop.eup %3997 }
 0x286   : > { %v4000_v38 = vpop.eup %3999 }
 0x287   : > { %v4002_v50 = vpop.eup %4001  ;;  %v1377_v19 = vpack.c.bf16 %v4000_v38, %v3996_v37 }
 0x288   : > { %v1376_v27 = vpack.c.bf16 %v4002_v50, %v3998_v23 }
 0x28a   : > { %3519 = vmatprep.mubr.bf16.mxu1 %v1376_v27 }
 0x28b   : > { %3520 = vmatmul.mubr.bf16.gmra.mrb[36].mxu1 %v1377_v19 }
 0x2a3   : > { %v3477_v3 = vpop.f32.mrb[8].mxu1 }
 0x2a4   : > { %v1312_v58 = vadd.f32 %v3477_v3, %v5064_v2  ;;  %v1303_v56 = vpop.f32.mrb[9].mxu1 }
 0x2a5   : > { %v1304_v36 = vadd.f32 %v5064_v2, %v1303_v56  ;;  %v3478_v13 = vpop.f32.mrb[10].mxu1 }
 0x2a6   : > { %4003 = vtanh.f32 %v1312_v58  ;;  %v1315_v7 = vadd.f32 %v3478_v13, %v5064_v2  ;;  %v1306_v0 = vpop.f32.mrb[11].mxu1 }
 0x2a7   : > { %4005 = vtanh.f32 %v1304_v36  ;;  %v1307_v17 = vadd.f32 %v5064_v2, %v1306_v0 }
 0x2a8   : > { %4007 = vtanh.f32 %v1315_v7 }
 0x2a9   : > { %4009 = vtanh.f32 %v1307_v17 }
 0x2b0   : > { %v4004_v29 = vpop.eup %4003 }
 0x2b1   : > { %v4006_v40 = vpop.eup %4005 }
 0x2b2   : > { %v4008_v16 = vpop.eup %4007 }
 0x2b3   : > { %v4010_v44 = vpop.eup %4009  ;;  %v1379_v63 = vpack.c.bf16 %v4008_v16, %v4004_v29 }
 0x2b4   : > { %v1378_v57 = vpack.c.bf16 %v4010_v44, %v4006_v40 }
 0x2b6   : > { %3523 = vmatprep.mubr.bf16.mxu1 %v1378_v57 }
 0x2b7   : > { %3524 = vmatmul.mubr.bf16.gmra.mrb[40].mxu1 %v1379_v63 }
 0x2cf   : > { %v3481_v5 = vpop.f32.mrb[12].mxu1 }
 0x2d0   : > { %v1328_v53 = vadd.f32 %v3481_v5, %v5064_v2  ;;  %v1319_v43 = vpop.f32.mrb[13].mxu1 }
 0x2d1   : > { %v1320_v62 = vadd.f32 %v5064_v2, %v1319_v43  ;;  %v3482_v31 = vpop.f32.mrb[14].mxu1 }
 0x2d2   : > { %4011 = vtanh.f32 %v1328_v53  ;;  %v1331_v9 = vadd.f32 %v3482_v31, %v5064_v2  ;;  %v1322_v52 = vpop.f32.mrb[15].mxu1 }
 0x2d3   : > { %4013 = vtanh.f32 %v1320_v62  ;;  %v1323_v30 = vadd.f32 %v5064_v2, %v1322_v52 }
 0x2d4   : > { %4015 = vtanh.f32 %v1331_v9 }
 0x2d5   : > { %4017 = vtanh.f32 %v1323_v30 }
 0x2dc   : > { %v4012_v18 = vpop.eup %4011 }
 0x2dd   : > { %v4014_v59 = vpop.eup %4013 }
 0x2de   : > { %v4016_v8 = vpop.eup %4015 }
 0x2df   : > { %v4018_v32 = vpop.eup %4017  ;;  %v1381_v20 = vpack.c.bf16 %v4016_v8, %v4012_v18 }
 0x2e0   : > { %v1380_v4 = vpack.c.bf16 %v4018_v32, %v4014_v59 }
 0x2e2   : > { %3527 = vmatprep.mubr.bf16.mxu1 %v1380_v4 }
 0x2e3   : > { %3528 = vmatmul.mubr.bf16.gmra.mrb[44].mxu1 %v1381_v20 }
 0x2ea   : > { %v3501_v39 = vpop.f32.mrb[16].mxu1 }
 0x2eb   : > { %v1495_v35 = vadd.f32 %v3501_v39, %v5125_v28  ;;  %v1486_v22 = vpop.f32.mrb[17].mxu1 }
 0x2ec   : > { %v1487_v2 = vadd.f32 %v5125_v28, %v1486_v22  ;;  %v3502_v60 = vpop.f32.mrb[18].mxu1 }
 0x2ed   : > { %4019 = vtanh.f32 %v1495_v35  ;;  %v1498_v24 = vadd.f32 %v3502_v60, %v5125_v28  ;;  %v1489_v15 = vpop.f32.mrb[19].mxu1  ;;  %v3859_v35 = vld [vmem:[%s5484_s2 + $0xc0] sm:$0xff]  }
 0x2ee   : > { %4021 = vtanh.f32 %v1487_v2  ;;  %v1490_v1 = vadd.f32 %v5125_v28, %v1489_v15  ;;  %3579 = vmatprep.subr.bf16.mxu1 %v3859_v35 }
 0x2ef   : > { %4023 = vtanh.f32 %v1498_v24  ;;  %3580 = vmatpush3.bf16.msra.mxu1 %v3859_v35 }
 0x2f0   : > { %4025 = vtanh.f32 %v1490_v1 }
 0x2f2   : > { %v3505_v6 = vpop.f32.mrb[20].mxu1 }
 0x2f3   : > { %v1511_v21 = vadd.f32 %v3505_v6, %v5125_v28  ;;  %v1502_v47 = vpop.f32.mrb[21].mxu1  ;;  %v3860_v6 = vld [vmem:[%s5484_s2 + $0xc8] sm:$0xff]  }
 0x2f4   : > { %v1503_v49 = vadd.f32 %v5125_v28, %v1502_v47  ;;  %v3506_v41 = vpop.f32.mrb[22].mxu1  ;;  %3581 = vmatprep.subr.bf16.mxu1 %v3860_v6  ;;  %v3862_v47 = vld [vmem:[%s5484_s2 + $0xd8] sm:$0xff]  }
 0x2f5   : > { %4027 = vtanh.f32 %v1511_v21  ;;  %v1514_v14 = vadd.f32 %v3506_v41, %v5125_v28  ;;  %v1505_v55 = vpop.f32.mrb[23].mxu1  ;;  %v3861_v21 = vld [vmem:[%s5484_s2 + $0xd0] sm:$0xff]   ;;  %3582 = vmatpush3.bf16.msra.mxu1 %v3860_v6  ;;  %v3864_v41 = vld [vmem:[%s5484_s2 + $0xe8] sm:$0xff]  }
 0x2f6   : > { %4029 = vtanh.f32 %v1503_v49  ;;  %v1506_v11 = vadd.f32 %v5125_v28, %v1505_v55  ;;  %3583 = vmatprep.subr.bf16.mxu1 %v3861_v21  ;;  %v3863_v49 = vld [vmem:[%s5484_s2 + $0xe0] sm:$0xff]  }
 0x2f7   : > { %v4020_v42 = vpop.eup %4019  ;;  %4031 = vtanh.f32 %v1514_v14  ;;  %v3865_v14 = vld [vmem:[%s5484_s2 + $0xf0] sm:$0xff]  }
 0x2f8   : > { %v4022_v12 = vpop.eup %4021  ;;  %4033 = vtanh.f32 %v1506_v11 }
 0x2f9   : > { %v4024_v61 = vpop.eup %4023  ;;  %3584 = vmatpush3.bf16.msra.mxu1 %v3861_v21 }
 0x2fa   : > { %v4026_v34 = vpop.eup %4025  ;;  %v3509_v33 = vpop.f32.mrb[24].mxu1  ;;  %v1646_v54 = vpack.c.bf16 %v4024_v61, %v4020_v42  ;;  %3585 = vmatprep.subr.bf16.mxu1 %v3862_v47 }
 0x2fb   : > { %v1527_v46 = vadd.f32 %v3509_v33, %v5125_v28  ;;  %v1518_v10 = vpop.f32.mrb[25].mxu1  ;;  %v1645_v51 = vpack.c.bf16 %v4026_v34, %v4022_v12  ;;  %v3866_v34 = vld [vmem:[%s5484_s2 + $0xf8] sm:$0xff]  }
 0x2fc   : > { %v1519_v45 = vadd.f32 %v5125_v28, %v1518_v10  ;;  %v3510_v48 = vpop.f32.mrb[26].mxu1 }
 0x2fd   : > { %4035 = vtanh.f32 %v1527_v46  ;;  %v1530_v25 = vadd.f32 %v3510_v48, %v5125_v28  ;;  %v1521_v26 = vpop.f32.mrb[27].mxu1  ;;  %3547 = vmatprep.mubr.bf16.mxu0 %v1645_v51  ;;  %3586 = vmatpush3.bf16.msra.mxu1 %v3862_v47 }
 0x2fe   : > { %4037 = vtanh.f32 %v1519_v45  ;;  %v1522_v37 = vadd.f32 %v5125_v28, %v1521_v26  ;;  %3548 = vmatmul.mubr.bf16.vlgmr.msra.gmra.mrb[16].mxu0 %v1646_v54  ;;  %3587 = vmatprep.subr.bf16.mxu1 %v3863_v49 }
 0x2ff   : > { %v4028_v23 = vpop.eup %4027  ;;  %4039 = vtanh.f32 %v1530_v25 }
 0x300   : > { %v4030_v38 = vpop.eup %4029  ;;  %4041 = vtanh.f32 %v1522_v37 }
 0x301   : > { %v4032_v50 = vpop.eup %4031  ;;  %3588 = vmatpush3.bf16.msra.mxu1 %v3863_v49 }
 0x302   : > { %v4034_v19 = vpop.eup %4033  ;;  %v1648_v27 = vpack.c.bf16 %v4032_v50, %v4028_v23  ;;  %3589 = vmatprep.subr.bf16.mxu1 %v3864_v41 }
 0x303   : > { %v1647_v3 = vpack.c.bf16 %v4034_v19, %v4030_v38 }
 0x305   : > { %3551 = vmatprep.mubr.bf16.mxu0 %v1647_v3  ;;  %3590 = vmatpush3.bf16.msra.mxu1 %v3864_v41 }
 0x306   : > { %v3513_v58 = vpop.f32.mrb[28].mxu1  ;;  %3552 = vmatmul.mubr.bf16.gmra.mrb[20].mxu0 %v1648_v27  ;;  %3591 = vmatprep.subr.bf16.mxu1 %v3865_v14 }
 0x307   : > { %v4036_v56 = vpop.eup %4035  ;;  %v1543_v36 = vadd.f32 %v3513_v58, %v5125_v28  ;;  %v1534_v13 = vpop.f32.mrb[29].mxu1 }
 0x308   : > { %v4038_v7 = vpop.eup %4037  ;;  %v1535_v0 = vadd.f32 %v5125_v28, %v1534_v13  ;;  %v3514_v17 = vpop.f32.mrb[30].mxu1 }
 0x309   : > { %v4040_v29 = vpop.eup %4039  ;;  %4043 = vtanh.f32 %v1543_v36  ;;  %v1546_v40 = vadd.f32 %v3514_v17, %v5125_v28  ;;  %v1537_v16 = vpop.f32.mrb[31].mxu1  ;;  %3592 = vmatpush3.bf16.msra.mxu1 %v3865_v14 }
 0x30a   : > { %v4042_v44 = vpop.eup %4041  ;;  %4045 = vtanh.f32 %v1535_v0  ;;  %v1538_v63 = vadd.f32 %v5125_v28, %v1537_v16  ;;  %v1650_v57 = vpack.c.bf16 %v4040_v29, %v4036_v56  ;;  %3593 = vmatprep.subr.bf16.mxu1 %v3866_v34 }
 0x30b   : > { %4047 = vtanh.f32 %v1546_v40  ;;  %v1649_v5 = vpack.c.bf16 %v4042_v44, %v4038_v7 }
 0x30c   : > { %4049 = vtanh.f32 %v1538_v63 }
 0x30d   : > { %3555 = vmatprep.mubr.bf16.mxu0 %v1649_v5  ;;  %3594 = vmatpush3.bf16.msra.mxu1 %v3866_v34 }
 0x30e   : > { %3556 = vmatmul.mubr.bf16.gmra.mrb[24].mxu0 %v1650_v57 }
 0x313   : > { %v4044_v53 = vpop.eup %4043 }
 0x314   : > { %v4046_v43 = vpop.eup %4045 }
 0x315   : > { %v4048_v62 = vpop.eup %4047 }
 0x316   : > { %v4050_v31 = vpop.eup %4049  ;;  %v1652_v9 = vpack.c.bf16 %v4048_v62, %v4044_v53 }
 0x317   : > { %v1651_v52 = vpack.c.bf16 %v4050_v31, %v4046_v43 }
 0x319   : > { %3559 = vmatprep.mubr.bf16.mxu0 %v1651_v52 }
 0x31a   : > { %3560 = vmatmul.mubr.bf16.gmra.mrb[28].mxu0 %v1652_v9 }
 0x332   : > { %v3517_v30 = vpop.f32.mrb[32].mxu1 }
 0x333   : > { %v1559_v18 = vadd.f32 %v3517_v30, %v5125_v28  ;;  %v1550_v59 = vpop.f32.mrb[33].mxu1 }
 0x334   : > { %v1551_v8 = vadd.f32 %v5125_v28, %v1550_v59  ;;  %v3518_v32 = vpop.f32.mrb[34].mxu1 }
 0x335   : > { %4051 = vtanh.f32 %v1559_v18  ;;  %v1562_v20 = vadd.f32 %v3518_v32, %v5125_v28  ;;  %v1553_v4 = vpop.f32.mrb[35].mxu1  ;;  %v5186_v18 = vld [vmem:[%s5485_s3 + $0x3] ss:$0 sm:$0xff] }
 0x336   : > { %4053 = vtanh.f32 %v1551_v8  ;;  %v1554_v39 = vadd.f32 %v5125_v28, %v1553_v4 }
 0x337   : > { %4055 = vtanh.f32 %v1562_v20 }
 0x338   : > { %4057 = vtanh.f32 %v1554_v39 }
 0x33f   : > { %v4052_v22 = vpop.eup %4051 }
 0x340   : > { %v4054_v2 = vpop.eup %4053 }
 0x341   : > { %v4056_v60 = vpop.eup %4055 }
 0x342   : > { %v4058_v24 = vpop.eup %4057  ;;  %v1654_v15 = vpack.c.bf16 %v4056_v60, %v4052_v22 }
 0x343   : > { %v1653_v1 = vpack.c.bf16 %v4058_v24, %v4054_v2 }
 0x345   : > { %3563 = vmatprep.mubr.bf16.mxu0 %v1653_v1 }
 0x346   : > { %3564 = vmatmul.mubr.bf16.gmra.mrb[32].mxu0 %v1654_v15 }
 0x35e   : > { %v3521_v55 = vpop.f32.mrb[36].mxu1 }
 0x35f   : > { %v1575_v11 = vadd.f32 %v3521_v55, %v5125_v28  ;;  %v1566_v42 = vpop.f32.mrb[37].mxu1 }
 0x360   : > { %v1567_v12 = vadd.f32 %v5125_v28, %v1566_v42  ;;  %v3522_v61 = vpop.f32.mrb[38].mxu1 }
 0x361   : > { %4059 = vtanh.f32 %v1575_v11  ;;  %v1578_v33 = vadd.f32 %v3522_v61, %v5125_v28  ;;  %v1569_v54 = vpop.f32.mrb[39].mxu1 }
 0x362   : > { %4061 = vtanh.f32 %v1567_v12  ;;  %v1570_v46 = vadd.f32 %v5125_v28, %v1569_v54 }
 0x363   : > { %4063 = vtanh.f32 %v1578_v33 }
 0x364   : > { %4065 = vtanh.f32 %v1570_v46 }
 0x36b   : > { %v4060_v10 = vpop.eup %4059 }
 0x36c   : > { %v4062_v51 = vpop.eup %4061 }
 0x36d   : > { %v4064_v45 = vpop.eup %4063 }
 0x36e   : > { %v4066_v48 = vpop.eup %4065  ;;  %v1656_v25 = vpack.c.bf16 %v4064_v45, %v4060_v10 }
 0x36f   : > { %v1655_v26 = vpack.c.bf16 %v4066_v48, %v4062_v51 }
 0x371   : > { %3567 = vmatprep.mubr.bf16.mxu0 %v1655_v26 }
 0x372   : > { %3568 = vmatmul.mubr.bf16.gmra.mrb[36].mxu0 %v1656_v25 }
 0x38a   : > { %v3525_v37 = vpop.f32.mrb[40].mxu1 }
 0x38b   : > { %v1591_v23 = vadd.f32 %v3525_v37, %v5125_v28  ;;  %v1582_v38 = vpop.f32.mrb[41].mxu1 }
 0x38c   : > { %v1583_v50 = vadd.f32 %v5125_v28, %v1582_v38  ;;  %v3526_v19 = vpop.f32.mrb[42].mxu1 }
 0x38d   : > { %4067 = vtanh.f32 %v1591_v23  ;;  %v1594_v27 = vadd.f32 %v3526_v19, %v5125_v28  ;;  %v1585_v3 = vpop.f32.mrb[43].mxu1 }
 0x38e   : > { %4069 = vtanh.f32 %v1583_v50  ;;  %v1586_v58 = vadd.f32 %v5125_v28, %v1585_v3 }
 0x38f   : > { %4071 = vtanh.f32 %v1594_v27 }
 0x390   : > { %4073 = vtanh.f32 %v1586_v58 }
 0x397   : > { %v4068_v56 = vpop.eup %4067 }
 0x398   : > { %v4070_v36 = vpop.eup %4069 }
 0x399   : > { %v4072_v13 = vpop.eup %4071 }
 0x39a   : > { %v4074_v7 = vpop.eup %4073  ;;  %v1658_v0 = vpack.c.bf16 %v4072_v13, %v4068_v56 }
 0x39b   : > { %v1657_v17 = vpack.c.bf16 %v4074_v7, %v4070_v36 }
 0x39d   : > { %3571 = vmatprep.mubr.bf16.mxu0 %v1657_v17 }
 0x39e   : > { %3572 = vmatmul.mubr.bf16.gmra.mrb[40].mxu0 %v1658_v0 }
 0x3b6   : > { %v3529_v29 = vpop.f32.mrb[44].mxu1 }
 0x3b7   : > { %v1607_v40 = vadd.f32 %v3529_v29, %v5125_v28  ;;  %v1598_v16 = vpop.f32.mrb[45].mxu1 }
 0x3b8   : > { %v1599_v44 = vadd.f32 %v5125_v28, %v1598_v16  ;;  %v3530_v63 = vpop.f32.mrb[46].mxu1 }
 0x3b9   : > { %4075 = vtanh.f32 %v1607_v40  ;;  %v1610_v57 = vadd.f32 %v3530_v63, %v5125_v28  ;;  %v1601_v5 = vpop.f32.mrb[47].mxu1 }
 0x3ba   : > { %4077 = vtanh.f32 %v1599_v44  ;;  %v1602_v53 = vadd.f32 %v5125_v28, %v1601_v5 }
 0x3bb   : > { %4079 = vtanh.f32 %v1610_v57 }
 0x3bc   : > { %4081 = vtanh.f32 %v1602_v53 }
 0x3c3   : > { %v4076_v43 = vpop.eup %4075 }
 0x3c4   : > { %v4078_v62 = vpop.eup %4077 }
 0x3c5   : > { %v4080_v31 = vpop.eup %4079 }
 0x3c6   : > { %v4082_v9 = vpop.eup %4081  ;;  %v1660_v52 = vpack.c.bf16 %v4080_v31, %v4076_v43 }
 0x3c7   : > { %v1659_v30 = vpack.c.bf16 %v4082_v9, %v4078_v62 }
 0x3c9   : > { %3575 = vmatprep.mubr.bf16.mxu0 %v1659_v30 }
 0x3ca   : > { %3576 = vmatmul.mubr.bf16.gmra.mrb[44].mxu0 %v1660_v52 }
 0x3d1   : > { %v3549_v59 = vpop.f32.mrb[16].mxu0 }
 0x3d2   : > { %v1774_v8 = vadd.f32 %v3549_v59, %v5186_v18  ;;  %v1765_v32 = vpop.f32.mrb[17].mxu0 }
 0x3d3   : > { %v1766_v28 = vadd.f32 %v5186_v18, %v1765_v32  ;;  %v3550_v20 = vpop.f32.mrb[18].mxu0 }
 0x3d4   : > { %4083 = vtanh.f32 %v1774_v8  ;;  %v1777_v4 = vadd.f32 %v3550_v20, %v5186_v18  ;;  %v1768_v39 = vpop.f32.mrb[19].mxu0  ;;  %v3867_v8 = vld [vmem:[%s5484_s2 + $0x100] sm:$0xff]  }
 0x3d5   : > { %4085 = vtanh.f32 %v1766_v28  ;;  %v1769_v35 = vadd.f32 %v5186_v18, %v1768_v39  ;;  %3627 = vmatprep.subr.bf16.mxu0 %v3867_v8 }
 0x3d6   : > { %4087 = vtanh.f32 %v1777_v4  ;;  %3628 = vmatpush3.bf16.msra.mxu0 %v3867_v8 }
 0x3d7   : > { %4089 = vtanh.f32 %v1769_v35 }
 0x3d9   : > { %v3553_v22 = vpop.f32.mrb[20].mxu0 }
 0x3da   : > { %v1790_v2 = vadd.f32 %v3553_v22, %v5186_v18  ;;  %v1781_v60 = vpop.f32.mrb[21].mxu0  ;;  %v3868_v22 = vld [vmem:[%s5484_s2 + $0x108] sm:$0xff]  }
 0x3db   : > { %v1782_v24 = vadd.f32 %v5186_v18, %v1781_v60  ;;  %v3554_v15 = vpop.f32.mrb[22].mxu0  ;;  %3629 = vmatprep.subr.bf16.mxu0 %v3868_v22  ;;  %v3870_v60 = vld [vmem:[%s5484_s2 + $0x118] sm:$0xff]  }
 0x3dc   : > { %4091 = vtanh.f32 %v1790_v2  ;;  %v1793_v1 = vadd.f32 %v3554_v15, %v5186_v18  ;;  %v1784_v6 = vpop.f32.mrb[23].mxu0  ;;  %v3869_v2 = vld [vmem:[%s5484_s2 + $0x110] sm:$0xff]   ;;  %3630 = vmatpush3.bf16.msra.mxu0 %v3868_v22  ;;  %v3872_v15 = vld [vmem:[%s5484_s2 + $0x128] sm:$0xff]  }
 0x3dd   : > { %4093 = vtanh.f32 %v1782_v24  ;;  %v1785_v21 = vadd.f32 %v5186_v18, %v1784_v6  ;;  %3631 = vmatprep.subr.bf16.mxu0 %v3869_v2  ;;  %v3871_v24 = vld [vmem:[%s5484_s2 + $0x120] sm:$0xff]  }
 0x3de   : > { %v4084_v47 = vpop.eup %4083  ;;  %4095 = vtanh.f32 %v1793_v1  ;;  %v3873_v1 = vld [vmem:[%s5484_s2 + $0x130] sm:$0xff]  }
 0x3df   : > { %v4086_v49 = vpop.eup %4085  ;;  %4097 = vtanh.f32 %v1785_v21 }
 0x3e0   : > { %v4088_v41 = vpop.eup %4087  ;;  %3632 = vmatpush3.bf16.msra.mxu0 %v3869_v2 }
 0x3e1   : > { %v4090_v14 = vpop.eup %4089  ;;  %v3557_v55 = vpop.f32.mrb[24].mxu0  ;;  %v1925_v11 = vpack.c.bf16 %v4088_v41, %v4084_v47  ;;  %3633 = vmatprep.subr.bf16.mxu0 %v3870_v60 }
 0x3e2   : > { %v1806_v42 = vadd.f32 %v3557_v55, %v5186_v18  ;;  %v1797_v12 = vpop.f32.mrb[25].mxu0  ;;  %v1924_v61 = vpack.c.bf16 %v4090_v14, %v4086_v49  ;;  %v3874_v14 = vld [vmem:[%s5484_s2 + $0x138] sm:$0xff]  }
 0x3e3   : > { %v1798_v34 = vadd.f32 %v5186_v18, %v1797_v12  ;;  %v3558_v33 = vpop.f32.mrb[26].mxu0 }
 0x3e4   : > { %4099 = vtanh.f32 %v1806_v42  ;;  %v1809_v54 = vadd.f32 %v3558_v33, %v5186_v18  ;;  %v1800_v46 = vpop.f32.mrb[27].mxu0  ;;  %3595 = vmatprep.mubr.bf16.mxu1 %v1924_v61  ;;  %3634 = vmatpush3.bf16.msra.mxu0 %v3870_v60 }
 0x3e5   : > { %4101 = vtanh.f32 %v1798_v34  ;;  %v1801_v10 = vadd.f32 %v5186_v18, %v1800_v46  ;;  %3596 = vmatmul.mubr.bf16.vlgmr.msra.gmra.mrb[48].mxu1 %v1925_v11  ;;  %3635 = vmatprep.subr.bf16.mxu0 %v3871_v24 }
 0x3e6   : > { %v4092_v51 = vpop.eup %4091  ;;  %4103 = vtanh.f32 %v1809_v54 }
 0x3e7   : > { %v4094_v45 = vpop.eup %4093  ;;  %4105 = vtanh.f32 %v1801_v10 }
 0x3e8   : > { %v4096_v48 = vpop.eup %4095  ;;  %3636 = vmatpush3.bf16.msra.mxu0 %v3871_v24 }
 0x3e9   : > { %v4098_v25 = vpop.eup %4097  ;;  %v1927_v26 = vpack.c.bf16 %v4096_v48, %v4092_v51  ;;  %3637 = vmatprep.subr.bf16.mxu0 %v3872_v15 }
 0x3ea   : > { %v1926_v37 = vpack.c.bf16 %v4098_v25, %v4094_v45 }
 0x3ec   : > { %3599 = vmatprep.mubr.bf16.mxu1 %v1926_v37  ;;  %3638 = vmatpush3.bf16.msra.mxu0 %v3872_v15 }
 0x3ed   : > { %v3561_v23 = vpop.f32.mrb[28].mxu0  ;;  %3600 = vmatmul.mubr.bf16.gmra.mrb[52].mxu1 %v1927_v26  ;;  %3639 = vmatprep.subr.bf16.mxu0 %v3873_v1 }
 0x3ee   : > { %v4100_v38 = vpop.eup %4099  ;;  %v1822_v50 = vadd.f32 %v3561_v23, %v5186_v18  ;;  %v1813_v19 = vpop.f32.mrb[29].mxu0 }
 0x3ef   : > { %v4102_v27 = vpop.eup %4101  ;;  %v1814_v3 = vadd.f32 %v5186_v18, %v1813_v19  ;;  %v3562_v58 = vpop.f32.mrb[30].mxu0 }
 0x3f0   : > { %v4104_v56 = vpop.eup %4103  ;;  %4107 = vtanh.f32 %v1822_v50  ;;  %v1825_v36 = vadd.f32 %v3562_v58, %v5186_v18  ;;  %v1816_v13 = vpop.f32.mrb[31].mxu0  ;;  %3640 = vmatpush3.bf16.msra.mxu0 %v3873_v1 }
 0x3f1   : > { %v4106_v7 = vpop.eup %4105  ;;  %4109 = vtanh.f32 %v1814_v3  ;;  %v1817_v0 = vadd.f32 %v5186_v18, %v1816_v13  ;;  %v1929_v17 = vpack.c.bf16 %v4104_v56, %v4100_v38  ;;  %3641 = vmatprep.subr.bf16.mxu0 %v3874_v14 }
 0x3f2   : > { %4111 = vtanh.f32 %v1825_v36  ;;  %v1928_v29 = vpack.c.bf16 %v4106_v7, %v4102_v27 }
 0x3f3   : > { %4113 = vtanh.f32 %v1817_v0 }
 0x3f4   : > { %3603 = vmatprep.mubr.bf16.mxu1 %v1928_v29  ;;  %3642 = vmatpush3.bf16.msra.mxu0 %v3874_v14 }
 0x3f5   : > { %3604 = vmatmul.mubr.bf16.gmra.mrb[56].mxu1 %v1929_v17 }
 0x3fa   : > { %v4108_v40 = vpop.eup %4107 }
 0x3fb   : > { %v4110_v16 = vpop.eup %4109 }
 0x3fc   : > { %v4112_v44 = vpop.eup %4111 }
 0x3fd   : > { %v4114_v63 = vpop.eup %4113  ;;  %v1931_v57 = vpack.c.bf16 %v4112_v44, %v4108_v40 }
 0x3fe   : > { %v1930_v5 = vpack.c.bf16 %v4114_v63, %v4110_v16 }
 0x400   : > { %3607 = vmatprep.mubr.bf16.mxu1 %v1930_v5 }
 0x401   : > { %3608 = vmatmul.mubr.bf16.gmra.mrb[60].mxu1 %v1931_v57 }
 0x419   : > { %v3565_v53 = vpop.f32.mrb[32].mxu0 }
 0x41a   : > { %v1838_v43 = vadd.f32 %v3565_v53, %v5186_v18  ;;  %v1829_v62 = vpop.f32.mrb[33].mxu0 }
 0x41b   : > { %v1830_v31 = vadd.f32 %v5186_v18, %v1829_v62  ;;  %v3566_v9 = vpop.f32.mrb[34].mxu0 }
 0x41c   : > { %4115 = vtanh.f32 %v1838_v43  ;;  %v1841_v52 = vadd.f32 %v3566_v9, %v5186_v18  ;;  %v1832_v30 = vpop.f32.mrb[35].mxu0  ;;  %v5247_v43 = vld [vmem:[%s5485_s3 + $0x4] ss:$0 sm:$0xff] }
 0x41d   : > { %4117 = vtanh.f32 %v1830_v31  ;;  %v1833_v59 = vadd.f32 %v5186_v18, %v1832_v30 }
 0x41e   : > { %4119 = vtanh.f32 %v1841_v52 }
 0x41f   : > { %4121 = vtanh.f32 %v1833_v59 }
 0x426   : > { %v4116_v32 = vpop.eup %4115 }
 0x427   : > { %v4118_v28 = vpop.eup %4117 }
 0x428   : > { %v4120_v20 = vpop.eup %4119 }
 0x429   : > { %v4122_v4 = vpop.eup %4121  ;;  %v1933_v39 = vpack.c.bf16 %v4120_v20, %v4116_v32 }
 0x42a   : > { %v1932_v35 = vpack.c.bf16 %v4122_v4, %v4118_v28 }
 0x42c   : > { %3611 = vmatprep.mubr.bf16.mxu1 %v1932_v35 }
 0x42d   : > { %3612 = vmatmul.mubr.bf16.gmra.mrb[64].mxu1 %v1933_v39 }
 0x445   : > { %v3569_v6 = vpop.f32.mrb[36].mxu0 }
 0x446   : > { %v1854_v21 = vadd.f32 %v3569_v6, %v5186_v18  ;;  %v1845_v47 = vpop.f32.mrb[37].mxu0 }
 0x447   : > { %v1846_v49 = vadd.f32 %v5186_v18, %v1845_v47  ;;  %v3570_v41 = vpop.f32.mrb[38].mxu0 }
 0x448   : > { %4123 = vtanh.f32 %v1854_v21  ;;  %v1857_v55 = vadd.f32 %v3570_v41, %v5186_v18  ;;  %v1848_v11 = vpop.f32.mrb[39].mxu0 }
 0x449   : > { %4125 = vtanh.f32 %v1846_v49  ;;  %v1849_v42 = vadd.f32 %v5186_v18, %v1848_v11 }
 0x44a   : > { %4127 = vtanh.f32 %v1857_v55 }
 0x44b   : > { %4129 = vtanh.f32 %v1849_v42 }
 0x452   : > { %v4124_v12 = vpop.eup %4123 }
 0x453   : > { %v4126_v61 = vpop.eup %4125 }
 0x454   : > { %v4128_v34 = vpop.eup %4127 }
 0x455   : > { %v4130_v33 = vpop.eup %4129  ;;  %v1935_v54 = vpack.c.bf16 %v4128_v34, %v4124_v12 }
 0x456   : > { %v1934_v46 = vpack.c.bf16 %v4130_v33, %v4126_v61 }
 0x458   : > { %3615 = vmatprep.mubr.bf16.mxu1 %v1934_v46 }
 0x459   : > { %3616 = vmatmul.mubr.bf16.gmra.mrb[68].mxu1 %v1935_v54 }
 0x471   : > { %v3573_v10 = vpop.f32.mrb[40].mxu0 }
 0x472   : > { %v1870_v51 = vadd.f32 %v3573_v10, %v5186_v18  ;;  %v1861_v45 = vpop.f32.mrb[41].mxu0 }
 0x473   : > { %v1862_v48 = vadd.f32 %v5186_v18, %v1861_v45  ;;  %v3574_v25 = vpop.f32.mrb[42].mxu0 }
 0x474   : > { %4131 = vtanh.f32 %v1870_v51  ;;  %v1873_v26 = vadd.f32 %v3574_v25, %v5186_v18  ;;  %v1864_v37 = vpop.f32.mrb[43].mxu0 }
 0x475   : > { %4133 = vtanh.f32 %v1862_v48  ;;  %v1865_v23 = vadd.f32 %v5186_v18, %v1864_v37 }
 0x476   : > { %4135 = vtanh.f32 %v1873_v26 }
 0x477   : > { %4137 = vtanh.f32 %v1865_v23 }
 0x47e   : > { %v4132_v38 = vpop.eup %4131 }
 0x47f   : > { %v4134_v50 = vpop.eup %4133 }
 0x480   : > { %v4136_v19 = vpop.eup %4135 }
 0x481   : > { %v4138_v27 = vpop.eup %4137  ;;  %v1937_v3 = vpack.c.bf16 %v4136_v19, %v4132_v38 }
 0x482   : > { %v1936_v58 = vpack.c.bf16 %v4138_v27, %v4134_v50 }
 0x484   : > { %3619 = vmatprep.mubr.bf16.mxu1 %v1936_v58 }
 0x485   : > { %3620 = vmatmul.mubr.bf16.gmra.mrb[72].mxu1 %v1937_v3 }
 0x49d   : > { %v3577_v56 = vpop.f32.mrb[44].mxu0 }
 0x49e   : > { %v1886_v36 = vadd.f32 %v3577_v56, %v5186_v18  ;;  %v1877_v13 = vpop.f32.mrb[45].mxu0 }
 0x49f   : > { %v1878_v7 = vadd.f32 %v5186_v18, %v1877_v13  ;;  %v3578_v0 = vpop.f32.mrb[46].mxu0 }
 0x4a0   : > { %4139 = vtanh.f32 %v1886_v36  ;;  %v1889_v17 = vadd.f32 %v3578_v0, %v5186_v18  ;;  %v1880_v29 = vpop.f32.mrb[47].mxu0 }
 0x4a1   : > { %4141 = vtanh.f32 %v1878_v7  ;;  %v1881_v40 = vadd.f32 %v5186_v18, %v1880_v29 }
 0x4a2   : > { %4143 = vtanh.f32 %v1889_v17 }
 0x4a3   : > { %4145 = vtanh.f32 %v1881_v40 }
 0x4aa   : > { %v4140_v16 = vpop.eup %4139 }
 0x4ab   : > { %v4142_v44 = vpop.eup %4141 }
 0x4ac   : > { %v4144_v63 = vpop.eup %4143 }
 0x4ad   : > { %v4146_v57 = vpop.eup %4145  ;;  %v1939_v5 = vpack.c.bf16 %v4144_v63, %v4140_v16 }
 0x4ae   : > { %v1938_v53 = vpack.c.bf16 %v4146_v57, %v4142_v44 }
 0x4b0   : > { %3623 = vmatprep.mubr.bf16.mxu1 %v1938_v53 }
 0x4b1   : > { %3624 = vmatmul.mubr.bf16.gmra.mrb[76].mxu1 %v1939_v5 }
 0x4b8   : > { %v3597_v62 = vpop.f32.mrb[48].mxu1 }
 0x4b9   : > { %v2053_v31 = vadd.f32 %v3597_v62, %v5247_v43  ;;  %v2044_v9 = vpop.f32.mrb[49].mxu1 }
 0x4ba   : > { %v2045_v18 = vadd.f32 %v5247_v43, %v2044_v9  ;;  %v3598_v52 = vpop.f32.mrb[50].mxu1 }
 0x4bb   : > { %4147 = vtanh.f32 %v2053_v31  ;;  %v2056_v30 = vadd.f32 %v3598_v52, %v5247_v43  ;;  %v2047_v59 = vpop.f32.mrb[51].mxu1  ;;  %v3875_v31 = vld [vmem:[%s5484_s2 + $0x140] sm:$0xff]  }
 0x4bc   : > { %4149 = vtanh.f32 %v2045_v18  ;;  %v2048_v8 = vadd.f32 %v5247_v43, %v2047_v59  ;;  %3675 = vmatprep.subr.bf16.mxu1 %v3875_v31 }
 0x4bd   : > { %4151 = vtanh.f32 %v2056_v30  ;;  %3676 = vmatpush3.bf16.msra.mxu1 %v3875_v31 }
 0x4be   : > { %4153 = vtanh.f32 %v2048_v8 }
 0x4c0   : > { %v3601_v32 = vpop.f32.mrb[52].mxu1 }
 0x4c1   : > { %v2069_v28 = vadd.f32 %v3601_v32, %v5247_v43  ;;  %v2060_v20 = vpop.f32.mrb[53].mxu1  ;;  %v3876_v32 = vld [vmem:[%s5484_s2 + $0x148] sm:$0xff]  }
 0x4c2   : > { %v2061_v4 = vadd.f32 %v5247_v43, %v2060_v20  ;;  %v3602_v39 = vpop.f32.mrb[54].mxu1  ;;  %3677 = vmatprep.subr.bf16.mxu1 %v3876_v32  ;;  %v3878_v20 = vld [vmem:[%s5484_s2 + $0x158] sm:$0xff]  }
 0x4c3   : > { %4155 = vtanh.f32 %v2069_v28  ;;  %v2072_v35 = vadd.f32 %v3602_v39, %v5247_v43  ;;  %v2063_v22 = vpop.f32.mrb[55].mxu1  ;;  %v3877_v28 = vld [vmem:[%s5484_s2 + $0x150] sm:$0xff]   ;;  %3678 = vmatpush3.bf16.msra.mxu1 %v3876_v32  ;;  %v3880_v39 = vld [vmem:[%s5484_s2 + $0x168] sm:$0xff]  }
 0x4c4   : > { %4157 = vtanh.f32 %v2061_v4  ;;  %v2064_v2 = vadd.f32 %v5247_v43, %v2063_v22  ;;  %3679 = vmatprep.subr.bf16.mxu1 %v3877_v28  ;;  %v3879_v4 = vld [vmem:[%s5484_s2 + $0x160] sm:$0xff]  }
 0x4c5   : > { %v4148_v60 = vpop.eup %4147  ;;  %4159 = vtanh.f32 %v2072_v35  ;;  %v3881_v35 = vld [vmem:[%s5484_s2 + $0x170] sm:$0xff]  }
 0x4c6   : > { %v4150_v24 = vpop.eup %4149  ;;  %4161 = vtanh.f32 %v2064_v2 }
 0x4c7   : > { %v4152_v15 = vpop.eup %4151  ;;  %3680 = vmatpush3.bf16.msra.mxu1 %v3877_v28 }
 0x4c8   : > { %v4154_v1 = vpop.eup %4153  ;;  %v3605_v6 = vpop.f32.mrb[56].mxu1  ;;  %v2204_v21 = vpack.c.bf16 %v4152_v15, %v4148_v60  ;;  %3681 = vmatprep.subr.bf16.mxu1 %v3878_v20 }
 0x4c9   : > { %v2085_v47 = vadd.f32 %v3605_v6, %v5247_v43  ;;  %v2076_v49 = vpop.f32.mrb[57].mxu1  ;;  %v2203_v41 = vpack.c.bf16 %v4154_v1, %v4150_v24  ;;  %v3882_v1 = vld [vmem:[%s5484_s2 + $0x178] sm:$0xff]  }
 0x4ca   : > { %v2077_v14 = vadd.f32 %v5247_v43, %v2076_v49  ;;  %v3606_v55 = vpop.f32.mrb[58].mxu1 }
 0x4cb   : > { %4163 = vtanh.f32 %v2085_v47  ;;  %v2088_v11 = vadd.f32 %v3606_v55, %v5247_v43  ;;  %v2079_v42 = vpop.f32.mrb[59].mxu1  ;;  %3643 = vmatprep.mubr.bf16.mxu0 %v2203_v41  ;;  %3682 = vmatpush3.bf16.msra.mxu1 %v3878_v20 }
 0x4cc   : > { %4165 = vtanh.f32 %v2077_v14  ;;  %v2080_v12 = vadd.f32 %v5247_v43, %v2079_v42  ;;  %3644 = vmatmul.mubr.bf16.vlgmr.msra.gmra.mrb[48].mxu0 %v2204_v21  ;;  %3683 = vmatprep.subr.bf16.mxu1 %v3879_v4 }
 0x4cd   : > { %v4156_v61 = vpop.eup %4155  ;;  %4167 = vtanh.f32 %v2088_v11 }
 0x4ce   : > { %v4158_v34 = vpop.eup %4157  ;;  %4169 = vtanh.f32 %v2080_v12 }
 0x4cf   : > { %v4160_v33 = vpop.eup %4159  ;;  %3684 = vmatpush3.bf16.msra.mxu1 %v3879_v4 }
 0x4d0   : > { %v4162_v54 = vpop.eup %4161  ;;  %v2206_v46 = vpack.c.bf16 %v4160_v33, %v4156_v61  ;;  %3685 = vmatprep.subr.bf16.mxu1 %v3880_v39 }
 0x4d1   : > { %v2205_v10 = vpack.c.bf16 %v4162_v54, %v4158_v34 }
 0x4d3   : > { %3647 = vmatprep.mubr.bf16.mxu0 %v2205_v10  ;;  %3686 = vmatpush3.bf16.msra.mxu1 %v3880_v39 }
 0x4d4   : > { %v3609_v51 = vpop.f32.mrb[60].mxu1  ;;  %3648 = vmatmul.mubr.bf16.gmra.mrb[52].mxu0 %v2206_v46  ;;  %3687 = vmatprep.subr.bf16.mxu1 %v3881_v35 }
 0x4d5   : > { %v4164_v45 = vpop.eup %4163  ;;  %v2101_v48 = vadd.f32 %v3609_v51, %v5247_v43  ;;  %v2092_v25 = vpop.f32.mrb[61].mxu1 }
 0x4d6   : > { %v4166_v26 = vpop.eup %4165  ;;  %v2093_v37 = vadd.f32 %v5247_v43, %v2092_v25  ;;  %v3610_v23 = vpop.f32.mrb[62].mxu1 }
 0x4d7   : > { %v4168_v38 = vpop.eup %4167  ;;  %4171 = vtanh.f32 %v2101_v48  ;;  %v2104_v50 = vadd.f32 %v3610_v23, %v5247_v43  ;;  %v2095_v19 = vpop.f32.mrb[63].mxu1  ;;  %3688 = vmatpush3.bf16.msra.mxu1 %v3881_v35 }
 0x4d8   : > { %v4170_v27 = vpop.eup %4169  ;;  %4173 = vtanh.f32 %v2093_v37  ;;  %v2096_v3 = vadd.f32 %v5247_v43, %v2095_v19  ;;  %v2208_v58 = vpack.c.bf16 %v4168_v38, %v4164_v45  ;;  %3689 = vmatprep.subr.bf16.mxu1 %v3882_v1 }
 0x4d9   : > { %4175 = vtanh.f32 %v2104_v50  ;;  %v2207_v56 = vpack.c.bf16 %v4170_v27, %v4166_v26 }
 0x4da   : > { %4177 = vtanh.f32 %v2096_v3 }
 0x4db   : > { %3651 = vmatprep.mubr.bf16.mxu0 %v2207_v56  ;;  %3690 = vmatpush3.bf16.msra.mxu1 %v3882_v1 }
 0x4dc   : > { %3652 = vmatmul.mubr.bf16.gmra.mrb[56].mxu0 %v2208_v58 }
 0x4e1   : > { %v4172_v36 = vpop.eup %4171 }
 0x4e2   : > { %v4174_v13 = vpop.eup %4173 }
 0x4e3   : > { %v4176_v7 = vpop.eup %4175 }
 0x4e4   : > { %v4178_v0 = vpop.eup %4177  ;;  %v2210_v17 = vpack.c.bf16 %v4176_v7, %v4172_v36 }
 0x4e5   : > { %v2209_v29 = vpack.c.bf16 %v4178_v0, %v4174_v13 }
 0x4e7   : > { %3655 = vmatprep.mubr.bf16.mxu0 %v2209_v29 }
 0x4e8   : > { %3656 = vmatmul.mubr.bf16.gmra.mrb[60].mxu0 %v2210_v17 }
 0x500   : > { %v3613_v40 = vpop.f32.mrb[64].mxu1 }
 0x501   : > { %v2117_v16 = vadd.f32 %v3613_v40, %v5247_v43  ;;  %v2108_v44 = vpop.f32.mrb[65].mxu1 }
 0x502   : > { %v2109_v63 = vadd.f32 %v5247_v43, %v2108_v44  ;;  %v3614_v57 = vpop.f32.mrb[66].mxu1 }
 0x503   : > { %4179 = vtanh.f32 %v2117_v16  ;;  %v2120_v5 = vadd.f32 %v3614_v57, %v5247_v43  ;;  %v2111_v53 = vpop.f32.mrb[67].mxu1  ;;  %v5308_v16 = vld [vmem:[%s5485_s3 + $0x5] ss:$0 sm:$0xff] }
 0x504   : > { %4181 = vtanh.f32 %v2109_v63  ;;  %v2112_v62 = vadd.f32 %v5247_v43, %v2111_v53 }
 0x505   : > { %4183 = vtanh.f32 %v2120_v5 }
 0x506   : > { %4185 = vtanh.f32 %v2112_v62 }
 0x50d   : > { %v4180_v9 = vpop.eup %4179 }
 0x50e   : > { %v4182_v18 = vpop.eup %4181 }
 0x50f   : > { %v4184_v52 = vpop.eup %4183 }
 0x510   : > { %v4186_v30 = vpop.eup %4185  ;;  %v2212_v59 = vpack.c.bf16 %v4184_v52, %v4180_v9 }
 0x511   : > { %v2211_v8 = vpack.c.bf16 %v4186_v30, %v4182_v18 }
 0x513   : > { %3659 = vmatprep.mubr.bf16.mxu0 %v2211_v8 }
 0x514   : > { %3660 = vmatmul.mubr.bf16.gmra.mrb[64].mxu0 %v2212_v59 }
 0x52c   : > { %v3617_v22 = vpop.f32.mrb[68].mxu1 }
 0x52d   : > { %v2133_v2 = vadd.f32 %v3617_v22, %v5247_v43  ;;  %v2124_v60 = vpop.f32.mrb[69].mxu1 }
 0x52e   : > { %v2125_v24 = vadd.f32 %v5247_v43, %v2124_v60  ;;  %v3618_v15 = vpop.f32.mrb[70].mxu1 }
 0x52f   : > { %4187 = vtanh.f32 %v2133_v2  ;;  %v2136_v6 = vadd.f32 %v3618_v15, %v5247_v43  ;;  %v2127_v21 = vpop.f32.mrb[71].mxu1 }
 0x530   : > { %4189 = vtanh.f32 %v2125_v24  ;;  %v2128_v47 = vadd.f32 %v5247_v43, %v2127_v21 }
 0x531   : > { %4191 = vtanh.f32 %v2136_v6 }
 0x532   : > { %4193 = vtanh.f32 %v2128_v47 }
 0x539   : > { %v4188_v49 = vpop.eup %4187 }
 0x53a   : > { %v4190_v41 = vpop.eup %4189 }
 0x53b   : > { %v4192_v14 = vpop.eup %4191 }
 0x53c   : > { %v4194_v55 = vpop.eup %4193  ;;  %v2214_v11 = vpack.c.bf16 %v4192_v14, %v4188_v49 }
 0x53d   : > { %v2213_v42 = vpack.c.bf16 %v4194_v55, %v4190_v41 }
 0x53f   : > { %3663 = vmatprep.mubr.bf16.mxu0 %v2213_v42 }
 0x540   : > { %3664 = vmatmul.mubr.bf16.gmra.mrb[68].mxu0 %v2214_v11 }
 0x558   : > { %v3621_v12 = vpop.f32.mrb[72].mxu1 }
 0x559   : > { %v2149_v61 = vadd.f32 %v3621_v12, %v5247_v43  ;;  %v2140_v34 = vpop.f32.mrb[73].mxu1 }
 0x55a   : > { %v2141_v33 = vadd.f32 %v5247_v43, %v2140_v34  ;;  %v3622_v54 = vpop.f32.mrb[74].mxu1 }
 0x55b   : > { %4195 = vtanh.f32 %v2149_v61  ;;  %v2152_v46 = vadd.f32 %v3622_v54, %v5247_v43  ;;  %v2143_v10 = vpop.f32.mrb[75].mxu1 }
 0x55c   : > { %4197 = vtanh.f32 %v2141_v33  ;;  %v2144_v51 = vadd.f32 %v5247_v43, %v2143_v10 }
 0x55d   : > { %4199 = vtanh.f32 %v2152_v46 }
 0x55e   : > { %4201 = vtanh.f32 %v2144_v51 }
 0x565   : > { %v4196_v45 = vpop.eup %4195 }
 0x566   : > { %v4198_v48 = vpop.eup %4197 }
 0x567   : > { %v4200_v25 = vpop.eup %4199 }
 0x568   : > { %v4202_v26 = vpop.eup %4201  ;;  %v2216_v37 = vpack.c.bf16 %v4200_v25, %v4196_v45 }
 0x569   : > { %v2215_v23 = vpack.c.bf16 %v4202_v26, %v4198_v48 }
 0x56b   : > { %3667 = vmatprep.mubr.bf16.mxu0 %v2215_v23 }
 0x56c   : > { %3668 = vmatmul.mubr.bf16.gmra.mrb[72].mxu0 %v2216_v37 }
 0x584   : > { %v3625_v38 = vpop.f32.mrb[76].mxu1 }
 0x585   : > { %v2165_v50 = vadd.f32 %v3625_v38, %v5247_v43  ;;  %v2156_v19 = vpop.f32.mrb[77].mxu1 }
 0x586   : > { %v2157_v27 = vadd.f32 %v5247_v43, %v2156_v19  ;;  %v3626_v3 = vpop.f32.mrb[78].mxu1 }
 0x587   : > { %4203 = vtanh.f32 %v2165_v50  ;;  %v2168_v58 = vadd.f32 %v3626_v3, %v5247_v43  ;;  %v2159_v56 = vpop.f32.mrb[79].mxu1 }
 0x588   : > { %4205 = vtanh.f32 %v2157_v27  ;;  %v2160_v36 = vadd.f32 %v5247_v43, %v2159_v56 }
 0x589   : > { %4207 = vtanh.f32 %v2168_v58 }
 0x58a   : > { %4209 = vtanh.f32 %v2160_v36 }
 0x591   : > { %v4204_v13 = vpop.eup %4203 }
 0x592   : > { %v4206_v7 = vpop.eup %4205 }
 0x593   : > { %v4208_v0 = vpop.eup %4207 }
 0x594   : > { %v4210_v17 = vpop.eup %4209  ;;  %v2218_v29 = vpack.c.bf16 %v4208_v0, %v4204_v13 }
 0x595   : > { %v2217_v40 = vpack.c.bf16 %v4210_v17, %v4206_v7 }
 0x597   : > { %3671 = vmatprep.mubr.bf16.mxu0 %v2217_v40 }
 0x598   : > { %3672 = vmatmul.mubr.bf16.gmra.mrb[76].mxu0 %v2218_v29 }
 0x59f   : > { %v3645_v44 = vpop.f32.mrb[48].mxu0 }
 0x5a0   : > { %v2332_v63 = vadd.f32 %v3645_v44, %v5308_v16  ;;  %v2323_v57 = vpop.f32.mrb[49].mxu0 }
 0x5a1   : > { %v2324_v43 = vadd.f32 %v5308_v16, %v2323_v57  ;;  %v3646_v5 = vpop.f32.mrb[50].mxu0 }
 0x5a2   : > { %4211 = vtanh.f32 %v2332_v63  ;;  %v2335_v53 = vadd.f32 %v3646_v5, %v5308_v16  ;;  %v2326_v62 = vpop.f32.mrb[51].mxu0  ;;  %v3883_v63 = vld [vmem:[%s5484_s2 + $0x180] sm:$0xff]  }
 0x5a3   : > { %4213 = vtanh.f32 %v2324_v43  ;;  %v2327_v31 = vadd.f32 %v5308_v16, %v2326_v62  ;;  %3723 = vmatprep.subr.bf16.mxu0 %v3883_v63 }
 0x5a4   : > { %4215 = vtanh.f32 %v2335_v53  ;;  %3724 = vmatpush3.bf16.msra.mxu0 %v3883_v63 }
 0x5a5   : > { %4217 = vtanh.f32 %v2327_v31 }
 0x5a7   : > { %v3649_v9 = vpop.f32.mrb[52].mxu0 }
 0x5a8   : > { %v2348_v18 = vadd.f32 %v3649_v9, %v5308_v16  ;;  %v2339_v52 = vpop.f32.mrb[53].mxu0  ;;  %v3884_v9 = vld [vmem:[%s5484_s2 + $0x188] sm:$0xff]  }
 0x5a9   : > { %v2340_v30 = vadd.f32 %v5308_v16, %v2339_v52  ;;  %v3650_v59 = vpop.f32.mrb[54].mxu0  ;;  %3725 = vmatprep.subr.bf16.mxu0 %v3884_v9  ;;  %v3886_v52 = vld [vmem:[%s5484_s2 + $0x198] sm:$0xff]  }
 0x5aa   : > { %4219 = vtanh.f32 %v2348_v18  ;;  %v2351_v8 = vadd.f32 %v3650_v59, %v5308_v16  ;;  %v2342_v32 = vpop.f32.mrb[55].mxu0  ;;  %v3885_v18 = vld [vmem:[%s5484_s2 + $0x190] sm:$0xff]   ;;  %3726 = vmatpush3.bf16.msra.mxu0 %v3884_v9  ;;  %v3888_v59 = vld [vmem:[%s5484_s2 + $0x1a8] sm:$0xff]  }
 0x5ab   : > { %4221 = vtanh.f32 %v2340_v30  ;;  %v2343_v28 = vadd.f32 %v5308_v16, %v2342_v32  ;;  %3727 = vmatprep.subr.bf16.mxu0 %v3885_v18  ;;  %v3887_v30 = vld [vmem:[%s5484_s2 + $0x1a0] sm:$0xff]  }
 0x5ac   : > { %v4212_v20 = vpop.eup %4211  ;;  %4223 = vtanh.f32 %v2351_v8  ;;  %v3889_v8 = vld [vmem:[%s5484_s2 + $0x1b0] sm:$0xff]  }
 0x5ad   : > { %v4214_v4 = vpop.eup %4213  ;;  %4225 = vtanh.f32 %v2343_v28 }
 0x5ae   : > { %v4216_v39 = vpop.eup %4215  ;;  %3728 = vmatpush3.bf16.msra.mxu0 %v3885_v18 }
 0x5af   : > { %v4218_v35 = vpop.eup %4217  ;;  %v3653_v22 = vpop.f32.mrb[56].mxu0  ;;  %v2483_v2 = vpack.c.bf16 %v4216_v39, %v4212_v20  ;;  %3729 = vmatprep.subr.bf16.mxu0 %v3886_v52 }
 0x5b0   : > { %v2364_v60 = vadd.f32 %v3653_v22, %v5308_v16  ;;  %v2355_v24 = vpop.f32.mrb[57].mxu0  ;;  %v2482_v15 = vpack.c.bf16 %v4218_v35, %v4214_v4  ;;  %v3890_v35 = vld [vmem:[%s5484_s2 + $0x1b8] sm:$0xff]  }
 0x5b1   : > { %v2356_v1 = vadd.f32 %v5308_v16, %v2355_v24  ;;  %v3654_v6 = vpop.f32.mrb[58].mxu0 }
 0x5b2   : > { %4227 = vtanh.f32 %v2364_v60  ;;  %v2367_v21 = vadd.f32 %v3654_v6, %v5308_v16  ;;  %v2358_v47 = vpop.f32.mrb[59].mxu0  ;;  %3691 = vmatprep.mubr.bf16.mxu1 %v2482_v15  ;;  %3730 = vmatpush3.bf16.msra.mxu0 %v3886_v52 }
 0x5b3   : > { %4229 = vtanh.f32 %v2356_v1  ;;  %v2359_v49 = vadd.f32 %v5308_v16, %v2358_v47  ;;  %3692 = vmatmul.mubr.bf16.vlgmr.msra.gmra.mrb[80].mxu1 %v2483_v2  ;;  %3731 = vmatprep.subr.bf16.mxu0 %v3887_v30 }
 0x5b4   : > { %v4220_v41 = vpop.eup %4219  ;;  %4231 = vtanh.f32 %v2367_v21 }
 0x5b5   : > { %v4222_v14 = vpop.eup %4221  ;;  %4233 = vtanh.f32 %v2359_v49 }
 0x5b6   : > { %v4224_v55 = vpop.eup %4223  ;;  %3732 = vmatpush3.bf16.msra.mxu0 %v3887_v30 }
 0x5b7   : > { %v4226_v11 = vpop.eup %4225  ;;  %v2485_v42 = vpack.c.bf16 %v4224_v55, %v4220_v41  ;;  %3733 = vmatprep.subr.bf16.mxu0 %v3888_v59 }
 0x5b8   : > { %v2484_v12 = vpack.c.bf16 %v4226_v11, %v4222_v14 }
 0x5ba   : > { %3695 = vmatprep.mubr.bf16.mxu1 %v2484_v12  ;;  %3734 = vmatpush3.bf16.msra.mxu0 %v3888_v59 }
 0x5bb   : > { %v3657_v61 = vpop.f32.mrb[60].mxu0  ;;  %3696 = vmatmul.mubr.bf16.gmra.mrb[84].mxu1 %v2485_v42  ;;  %3735 = vmatprep.subr.bf16.mxu0 %v3889_v8 }
 0x5bc   : > { %v4228_v34 = vpop.eup %4227  ;;  %v2380_v33 = vadd.f32 %v3657_v61, %v5308_v16  ;;  %v2371_v54 = vpop.f32.mrb[61].mxu0 }
 0x5bd   : > { %v4230_v46 = vpop.eup %4229  ;;  %v2372_v10 = vadd.f32 %v5308_v16, %v2371_v54  ;;  %v3658_v51 = vpop.f32.mrb[62].mxu0 }
 0x5be   : > { %v4232_v45 = vpop.eup %4231  ;;  %4235 = vtanh.f32 %v2380_v33  ;;  %v2383_v48 = vadd.f32 %v3658_v51, %v5308_v16  ;;  %v2374_v25 = vpop.f32.mrb[63].mxu0  ;;  %3736 = vmatpush3.bf16.msra.mxu0 %v3889_v8 }
 0x5bf   : > { %v4234_v26 = vpop.eup %4233  ;;  %4237 = vtanh.f32 %v2372_v10  ;;  %v2375_v37 = vadd.f32 %v5308_v16, %v2374_v25  ;;  %v2487_v23 = vpack.c.bf16 %v4232_v45, %v4228_v34  ;;  %3737 = vmatprep.subr.bf16.mxu0 %v3890_v35 }
 0x5c0   : > { %4239 = vtanh.f32 %v2383_v48  ;;  %v2486_v38 = vpack.c.bf16 %v4234_v26, %v4230_v46 }
 0x5c1   : > { %4241 = vtanh.f32 %v2375_v37 }
 0x5c2   : > { %3699 = vmatprep.mubr.bf16.mxu1 %v2486_v38  ;;  %3738 = vmatpush3.bf16.msra.mxu0 %v3890_v35 }
 0x5c3   : > { %3700 = vmatmul.mubr.bf16.gmra.mrb[88].mxu1 %v2487_v23 }
 0x5c8   : > { %v4236_v50 = vpop.eup %4235 }
 0x5c9   : > { %v4238_v19 = vpop.eup %4237 }
 0x5ca   : > { %v4240_v27 = vpop.eup %4239 }
 0x5cb   : > { %v4242_v3 = vpop.eup %4241  ;;  %v2489_v58 = vpack.c.bf16 %v4240_v27, %v4236_v50 }
 0x5cc   : > { %v2488_v56 = vpack.c.bf16 %v4242_v3, %v4238_v19 }
 0x5ce   : > { %3703 = vmatprep.mubr.bf16.mxu1 %v2488_v56 }
 0x5cf   : > { %3704 = vmatmul.mubr.bf16.gmra.mrb[92].mxu1 %v2489_v58 }
 0x5e7   : > { %v3661_v36 = vpop.f32.mrb[64].mxu0 }
 0x5e8   : > { %v2396_v13 = vadd.f32 %v3661_v36, %v5308_v16  ;;  %v2387_v7 = vpop.f32.mrb[65].mxu0 }
 0x5e9   : > { %v2388_v0 = vadd.f32 %v5308_v16, %v2387_v7  ;;  %v3662_v17 = vpop.f32.mrb[66].mxu0 }
 0x5ea   : > { %4243 = vtanh.f32 %v2396_v13  ;;  %v2399_v29 = vadd.f32 %v3662_v17, %v5308_v16  ;;  %v2390_v40 = vpop.f32.mrb[67].mxu0  ;;  %v5369_v13 = vld [vmem:[%s5485_s3 + $0x6] ss:$0 sm:$0xff] }
 0x5eb   : > { %4245 = vtanh.f32 %v2388_v0  ;;  %v2391_v44 = vadd.f32 %v5308_v16, %v2390_v40 }
 0x5ec   : > { %4247 = vtanh.f32 %v2399_v29 }
 0x5ed   : > { %4249 = vtanh.f32 %v2391_v44 }
 0x5f4   : > { %v4244_v57 = vpop.eup %4243 }
 0x5f5   : > { %v4246_v43 = vpop.eup %4245 }
 0x5f6   : > { %v4248_v5 = vpop.eup %4247 }
 0x5f7   : > { %v4250_v53 = vpop.eup %4249  ;;  %v2491_v62 = vpack.c.bf16 %v4248_v5, %v4244_v57 }
 0x5f8   : > { %v2490_v31 = vpack.c.bf16 %v4250_v53, %v4246_v43 }
 0x5fa   : > { %3707 = vmatprep.mubr.bf16.mxu1 %v2490_v31 }
 0x5fb   : > { %3708 = vmatmul.mubr.bf16.gmra.mrb[96].mxu1 %v2491_v62 }
 0x613   : > { %v3665_v32 = vpop.f32.mrb[68].mxu0 }
 0x614   : > { %v2412_v28 = vadd.f32 %v3665_v32, %v5308_v16  ;;  %v2403_v20 = vpop.f32.mrb[69].mxu0 }
 0x615   : > { %v2404_v4 = vadd.f32 %v5308_v16, %v2403_v20  ;;  %v3666_v39 = vpop.f32.mrb[70].mxu0 }
 0x616   : > { %4251 = vtanh.f32 %v2412_v28  ;;  %v2415_v22 = vadd.f32 %v3666_v39, %v5308_v16  ;;  %v2406_v2 = vpop.f32.mrb[71].mxu0 }
 0x617   : > { %4253 = vtanh.f32 %v2404_v4  ;;  %v2407_v60 = vadd.f32 %v5308_v16, %v2406_v2 }
 0x618   : > { %4255 = vtanh.f32 %v2415_v22 }
 0x619   : > { %4257 = vtanh.f32 %v2407_v60 }
 0x620   : > { %v4252_v24 = vpop.eup %4251 }
 0x621   : > { %v4254_v15 = vpop.eup %4253 }
 0x622   : > { %v4256_v1 = vpop.eup %4255 }
 0x623   : > { %v4258_v6 = vpop.eup %4257  ;;  %v2493_v21 = vpack.c.bf16 %v4256_v1, %v4252_v24 }
 0x624   : > { %v2492_v47 = vpack.c.bf16 %v4258_v6, %v4254_v15 }
 0x626   : > { %3711 = vmatprep.mubr.bf16.mxu1 %v2492_v47 }
 0x627   : > { %3712 = vmatmul.mubr.bf16.gmra.mrb[100].mxu1 %v2493_v21 }
 0x63f   : > { %v3669_v49 = vpop.f32.mrb[72].mxu0 }
 0x640   : > { %v2428_v41 = vadd.f32 %v3669_v49, %v5308_v16  ;;  %v2419_v14 = vpop.f32.mrb[73].mxu0 }
 0x641   : > { %v2420_v55 = vadd.f32 %v5308_v16, %v2419_v14  ;;  %v3670_v11 = vpop.f32.mrb[74].mxu0 }
 0x642   : > { %4259 = vtanh.f32 %v2428_v41  ;;  %v2431_v42 = vadd.f32 %v3670_v11, %v5308_v16  ;;  %v2422_v12 = vpop.f32.mrb[75].mxu0 }
 0x643   : > { %4261 = vtanh.f32 %v2420_v55  ;;  %v2423_v61 = vadd.f32 %v5308_v16, %v2422_v12 }
 0x644   : > { %4263 = vtanh.f32 %v2431_v42 }
 0x645   : > { %4265 = vtanh.f32 %v2423_v61 }
 0x64c   : > { %v4260_v34 = vpop.eup %4259 }
 0x64d   : > { %v4262_v33 = vpop.eup %4261 }
 0x64e   : > { %v4264_v54 = vpop.eup %4263 }
 0x64f   : > { %v4266_v46 = vpop.eup %4265  ;;  %v2495_v10 = vpack.c.bf16 %v4264_v54, %v4260_v34 }
 0x650   : > { %v2494_v51 = vpack.c.bf16 %v4266_v46, %v4262_v33 }
 0x652   : > { %3715 = vmatprep.mubr.bf16.mxu1 %v2494_v51 }
 0x653   : > { %3716 = vmatmul.mubr.bf16.gmra.mrb[104].mxu1 %v2495_v10 }
 0x66b   : > { %v3673_v45 = vpop.f32.mrb[76].mxu0 }
 0x66c   : > { %v2444_v48 = vadd.f32 %v3673_v45, %v5308_v16  ;;  %v2435_v25 = vpop.f32.mrb[77].mxu0 }
 0x66d   : > { %v2436_v26 = vadd.f32 %v5308_v16, %v2435_v25  ;;  %v3674_v37 = vpop.f32.mrb[78].mxu0 }
 0x66e   : > { %4267 = vtanh.f32 %v2444_v48  ;;  %v2447_v23 = vadd.f32 %v3674_v37, %v5308_v16  ;;  %v2438_v38 = vpop.f32.mrb[79].mxu0 }
 0x66f   : > { %4269 = vtanh.f32 %v2436_v26  ;;  %v2439_v50 = vadd.f32 %v5308_v16, %v2438_v38 }
 0x670   : > { %4271 = vtanh.f32 %v2447_v23 }
 0x671   : > { %4273 = vtanh.f32 %v2439_v50 }
 0x678   : > { %v4268_v19 = vpop.eup %4267 }
 0x679   : > { %v4270_v27 = vpop.eup %4269 }
 0x67a   : > { %v4272_v3 = vpop.eup %4271 }
 0x67b   : > { %v4274_v58 = vpop.eup %4273  ;;  %v2497_v56 = vpack.c.bf16 %v4272_v3, %v4268_v19 }
 0x67c   : > { %v2496_v36 = vpack.c.bf16 %v4274_v58, %v4270_v27 }
 0x67e   : > { %3719 = vmatprep.mubr.bf16.mxu1 %v2496_v36 }
 0x67f   : > { %3720 = vmatmul.mubr.bf16.gmra.mrb[108].mxu1 %v2497_v56 }
 0x686   : > { %v3693_v7 = vpop.f32.mrb[80].mxu1 }
 0x687   : > { %v2611_v0 = vadd.f32 %v3693_v7, %v5369_v13  ;;  %v2602_v17 = vpop.f32.mrb[81].mxu1 }
 0x688   : > { %v2603_v16 = vadd.f32 %v5369_v13, %v2602_v17  ;;  %v3694_v29 = vpop.f32.mrb[82].mxu1 }
 0x689   : > { %4275 = vtanh.f32 %v2611_v0  ;;  %v2614_v40 = vadd.f32 %v3694_v29, %v5369_v13  ;;  %v2605_v44 = vpop.f32.mrb[83].mxu1 }
 0x68a   : > { %4277 = vtanh.f32 %v2603_v16  ;;  %v2606_v63 = vadd.f32 %v5369_v13, %v2605_v44 }
 0x68b   : > { %4279 = vtanh.f32 %v2614_v40 }
 0x68c   : > { %4281 = vtanh.f32 %v2606_v63 }
 0x68e   : > { %v3697_v57 = vpop.f32.mrb[84].mxu1 }
 0x68f   : > { %v2627_v43 = vadd.f32 %v3697_v57, %v5369_v13  ;;  %v2618_v5 = vpop.f32.mrb[85].mxu1 }
 0x690   : > { %v2619_v53 = vadd.f32 %v5369_v13, %v2618_v5  ;;  %v3698_v62 = vpop.f32.mrb[86].mxu1 }
 0x691   : > { %4283 = vtanh.f32 %v2627_v43  ;;  %v2630_v31 = vadd.f32 %v3698_v62, %v5369_v13  ;;  %v2621_v9 = vpop.f32.mrb[87].mxu1 }
 0x692   : > { %4285 = vtanh.f32 %v2619_v53  ;;  %v2622_v18 = vadd.f32 %v5369_v13, %v2621_v9 }
 0x693   : > { %v4276_v52 = vpop.eup %4275  ;;  %4287 = vtanh.f32 %v2630_v31 }
 0x694   : > { %v4278_v30 = vpop.eup %4277  ;;  %4289 = vtanh.f32 %v2622_v18 }
 0x695   : > { %v4280_v59 = vpop.eup %4279 }
 0x696   : > { %v4282_v8 = vpop.eup %4281  ;;  %v3701_v32 = vpop.f32.mrb[88].mxu1  ;;  %v2762_v28 = vpack.c.bf16 %v4280_v59, %v4276_v52 }
 0x697   : > { %v2643_v20 = vadd.f32 %v3701_v32, %v5369_v13  ;;  %v2634_v4 = vpop.f32.mrb[89].mxu1  ;;  %v2761_v39 = vpack.c.bf16 %v4282_v8, %v4278_v30 }
 0x698   : > { %v2635_v35 = vadd.f32 %v5369_v13, %v2634_v4  ;;  %v3702_v22 = vpop.f32.mrb[90].mxu1 }
 0x699   : > { %4291 = vtanh.f32 %v2643_v20  ;;  %v2646_v2 = vadd.f32 %v3702_v22, %v5369_v13  ;;  %v2637_v60 = vpop.f32.mrb[91].mxu1  ;;  %3739 = vmatprep.mubr.bf16.mxu0 %v2761_v39 }
 0x69a   : > { %4293 = vtanh.f32 %v2635_v35  ;;  %v2638_v24 = vadd.f32 %v5369_v13, %v2637_v60  ;;  %3740 = vmatmul.mubr.bf16.vlgmr.msra.gmra.mrb[80].mxu0 %v2762_v28 }
 0x69b   : > { %v4284_v15 = vpop.eup %4283  ;;  %4295 = vtanh.f32 %v2646_v2 }
 0x69c   : > { %v4286_v1 = vpop.eup %4285  ;;  %4297 = vtanh.f32 %v2638_v24 }
 0x69d   : > { %v4288_v6 = vpop.eup %4287 }
 0x69e   : > { %v4290_v21 = vpop.eup %4289  ;;  %v2764_v47 = vpack.c.bf16 %v4288_v6, %v4284_v15 }
 0x69f   : > { %v2763_v49 = vpack.c.bf16 %v4290_v21, %v4286_v1 }
 0x6a1   : > { %3743 = vmatprep.mubr.bf16.mxu0 %v2763_v49 }
 0x6a2   : > { %v3705_v41 = vpop.f32.mrb[92].mxu1  ;;  %3744 = vmatmul.mubr.bf16.gmra.mrb[84].mxu0 %v2764_v47 }
 0x6a3   : > { %v4292_v14 = vpop.eup %4291  ;;  %v2659_v55 = vadd.f32 %v3705_v41, %v5369_v13  ;;  %v2650_v11 = vpop.f32.mrb[93].mxu1 }
 0x6a4   : > { %v4294_v42 = vpop.eup %4293  ;;  %v2651_v12 = vadd.f32 %v5369_v13, %v2650_v11  ;;  %v3706_v61 = vpop.f32.mrb[94].mxu1 }
 0x6a5   : > { %v4296_v34 = vpop.eup %4295  ;;  %4299 = vtanh.f32 %v2659_v55  ;;  %v2662_v33 = vadd.f32 %v3706_v61, %v5369_v13  ;;  %v2653_v54 = vpop.f32.mrb[95].mxu1 }
 0x6a6   : > { %v4298_v46 = vpop.eup %4297  ;;  %4301 = vtanh.f32 %v2651_v12  ;;  %v2654_v10 = vadd.f32 %v5369_v13, %v2653_v54  ;;  %v2766_v51 = vpack.c.bf16 %v4296_v34, %v4292_v14 }
 0x6a7   : > { %4303 = vtanh.f32 %v2662_v33  ;;  %v2765_v45 = vpack.c.bf16 %v4298_v46, %v4294_v42 }
 0x6a8   : > { %4305 = vtanh.f32 %v2654_v10 }
 0x6a9   : > { %3747 = vmatprep.mubr.bf16.mxu0 %v2765_v45  ;;  %v5406_v45 = vld [vmem:[%s5485_s3 + $0x7] ss:$0 sm:$0xff] }
 0x6aa   : > { %3748 = vmatmul.mubr.bf16.gmra.mrb[88].mxu0 %v2766_v51 }
 0x6af   : > { %v4300_v48 = vpop.eup %4299 }
 0x6b0   : > { %v4302_v25 = vpop.eup %4301 }
 0x6b1   : > { %v4304_v26 = vpop.eup %4303 }
 0x6b2   : > { %v4306_v37 = vpop.eup %4305  ;;  %v2768_v23 = vpack.c.bf16 %v4304_v26, %v4300_v48 }
 0x6b3   : > { %v2767_v38 = vpack.c.bf16 %v4306_v37, %v4302_v25 }
 0x6b5   : > { %3751 = vmatprep.mubr.bf16.mxu0 %v2767_v38 }
 0x6b6   : > { %3752 = vmatmul.mubr.bf16.gmra.mrb[92].mxu0 %v2768_v23 }
 0x6ce   : > { %v3709_v50 = vpop.f32.mrb[96].mxu1 }
 0x6cf   : > { %v2675_v19 = vadd.f32 %v3709_v50, %v5369_v13  ;;  %v2666_v27 = vpop.f32.mrb[97].mxu1 }
 0x6d0   : > { %v2667_v3 = vadd.f32 %v5369_v13, %v2666_v27  ;;  %v3710_v58 = vpop.f32.mrb[98].mxu1 }
 0x6d1   : > { %4307 = vtanh.f32 %v2675_v19  ;;  %v2678_v56 = vadd.f32 %v3710_v58, %v5369_v13  ;;  %v2669_v36 = vpop.f32.mrb[99].mxu1 }
 0x6d2   : > { %4309 = vtanh.f32 %v2667_v3  ;;  %v2670_v7 = vadd.f32 %v5369_v13, %v2669_v36 }
 0x6d3   : > { %4311 = vtanh.f32 %v2678_v56 }
 0x6d4   : > { %4313 = vtanh.f32 %v2670_v7 }
 0x6db   : > { %v4308_v0 = vpop.eup %4307 }
 0x6dc   : > { %v4310_v17 = vpop.eup %4309 }
 0x6dd   : > { %v4312_v16 = vpop.eup %4311 }
 0x6de   : > { %v4314_v29 = vpop.eup %4313  ;;  %v2770_v40 = vpack.c.bf16 %v4312_v16, %v4308_v0 }
 0x6df   : > { %v2769_v44 = vpack.c.bf16 %v4314_v29, %v4310_v17 }
 0x6e1   : > { %3755 = vmatprep.mubr.bf16.mxu0 %v2769_v44 }
 0x6e2   : > { %3756 = vmatmul.mubr.bf16.gmra.mrb[96].mxu0 %v2770_v40 }
 0x6fa   : > { %v3713_v63 = vpop.f32.mrb[100].mxu1 }
 0x6fb   : > { %v2691_v57 = vadd.f32 %v3713_v63, %v5369_v13  ;;  %v2682_v43 = vpop.f32.mrb[101].mxu1 }
 0x6fc   : > { %v2683_v5 = vadd.f32 %v5369_v13, %v2682_v43  ;;  %v3714_v53 = vpop.f32.mrb[102].mxu1 }
 0x6fd   : > { %4315 = vtanh.f32 %v2691_v57  ;;  %v2694_v62 = vadd.f32 %v3714_v53, %v5369_v13  ;;  %v2685_v31 = vpop.f32.mrb[103].mxu1 }
 0x6fe   : > { %4317 = vtanh.f32 %v2683_v5  ;;  %v2686_v9 = vadd.f32 %v5369_v13, %v2685_v31 }
 0x6ff   : > { %4319 = vtanh.f32 %v2694_v62 }
 0x700   : > { %4321 = vtanh.f32 %v2686_v9 }
 0x707   : > { %v4316_v18 = vpop.eup %4315 }
 0x708   : > { %v4318_v52 = vpop.eup %4317 }
 0x709   : > { %v4320_v30 = vpop.eup %4319 }
 0x70a   : > { %v4322_v59 = vpop.eup %4321  ;;  %v2772_v8 = vpack.c.bf16 %v4320_v30, %v4316_v18 }
 0x70b   : > { %v2771_v32 = vpack.c.bf16 %v4322_v59, %v4318_v52 }
 0x70d   : > { %3759 = vmatprep.mubr.bf16.mxu0 %v2771_v32 }
 0x70e   : > { %3760 = vmatmul.mubr.bf16.gmra.mrb[100].mxu0 %v2772_v8 }
 0x726   : > { %v3717_v28 = vpop.f32.mrb[104].mxu1 }
 0x727   : > { %v2707_v20 = vadd.f32 %v3717_v28, %v5369_v13  ;;  %v2698_v4 = vpop.f32.mrb[105].mxu1 }
 0x728   : > { %v2699_v39 = vadd.f32 %v5369_v13, %v2698_v4  ;;  %v3718_v35 = vpop.f32.mrb[106].mxu1 }
 0x729   : > { %4323 = vtanh.f32 %v2707_v20  ;;  %v2710_v22 = vadd.f32 %v3718_v35, %v5369_v13  ;;  %v2701_v2 = vpop.f32.mrb[107].mxu1 }
 0x72a   : > { %4325 = vtanh.f32 %v2699_v39  ;;  %v2702_v60 = vadd.f32 %v5369_v13, %v2701_v2 }
 0x72b   : > { %4327 = vtanh.f32 %v2710_v22 }
 0x72c   : > { %4329 = vtanh.f32 %v2702_v60 }
 0x733   : > { %v4324_v24 = vpop.eup %4323 }
 0x734   : > { %v4326_v15 = vpop.eup %4325 }
 0x735   : > { %v4328_v1 = vpop.eup %4327 }
 0x736   : > { %v4330_v6 = vpop.eup %4329  ;;  %v2774_v21 = vpack.c.bf16 %v4328_v1, %v4324_v24 }
 0x737   : > { %v2773_v47 = vpack.c.bf16 %v4330_v6, %v4326_v15 }
 0x739   : > { %3763 = vmatprep.mubr.bf16.mxu0 %v2773_v47 }
 0x73a   : > { %3764 = vmatmul.mubr.bf16.gmra.mrb[104].mxu0 %v2774_v21 }
 0x752   : > { %v3721_v49 = vpop.f32.mrb[108].mxu1 }
 0x753   : > { %v2723_v41 = vadd.f32 %v3721_v49, %v5369_v13  ;;  %v2714_v14 = vpop.f32.mrb[109].mxu1 }
 0x754   : > { %v2715_v55 = vadd.f32 %v5369_v13, %v2714_v14  ;;  %v3722_v11 = vpop.f32.mrb[110].mxu1 }
 0x755   : > { %4331 = vtanh.f32 %v2723_v41  ;;  %v2726_v42 = vadd.f32 %v3722_v11, %v5369_v13  ;;  %v2717_v12 = vpop.f32.mrb[111].mxu1 }
 0x756   : > { %4333 = vtanh.f32 %v2715_v55  ;;  %v2718_v61 = vadd.f32 %v5369_v13, %v2717_v12 }
 0x757   : > { %4335 = vtanh.f32 %v2726_v42 }
 0x758   : > { %4337 = vtanh.f32 %v2718_v61 }
 0x75f   : > { %v4332_v34 = vpop.eup %4331 }
 0x760   : > { %v4334_v33 = vpop.eup %4333 }
 0x761   : > { %v4336_v54 = vpop.eup %4335 }
 0x762   : > { %v4338_v46 = vpop.eup %4337  ;;  %v2776_v10 = vpack.c.bf16 %v4336_v54, %v4332_v34 }
 0x763   : > { %v2775_v51 = vpack.c.bf16 %v4338_v46, %v4334_v33 }
 0x765   : > { %3767 = vmatprep.mubr.bf16.mxu0 %v2775_v51 }
 0x766   : > { %3768 = vmatmul.mubr.bf16.gmra.mrb[108].mxu0 %v2776_v10 }
 0x76d   : > { %v3741_v13 = vpop.f32.mrb[80].mxu0 }
 0x76e   : > { %v2890_v48 = vadd.f32 %v3741_v13, %v5406_v45  ;;  %v2881_v25 = vpop.f32.mrb[81].mxu0 }
 0x76f   : > { %v2882_v26 = vadd.f32 %v5406_v45, %v2881_v25  ;;  %v3742_v37 = vpop.f32.mrb[82].mxu0 }
 0x770   : > { %3010 = vst [vmem:[%s5413_s16 + $0x10] sm:$0xff] %v2890_v48  ;;  %v2893_v23 = vadd.f32 %v3742_v37, %v5406_v45  ;;  %v2884_v38 = vpop.f32.mrb[83].mxu0 }
 0x771   : > { %3008 = vst [vmem:[%s5413_s16] sm:$0xff] %v2882_v26  ;;  %v2885_v50 = vadd.f32 %v5406_v45, %v2884_v38 }
 0x772   : > { %3011 = vst [vmem:[%s5413_s16 + $0x18] sm:$0xff] %v2893_v23 }
 0x773   : > { %3009 = vst [vmem:[%s5413_s16 + $0x8] sm:$0xff] %v2885_v50 }
 0x775   : > { %v3745_v19 = vpop.f32.mrb[84].mxu0 }
 0x776   : > { %v2906_v27 = vadd.f32 %v3745_v19, %v5406_v45  ;;  %v2897_v3 = vpop.f32.mrb[85].mxu0 }
 0x777   : > { %v2898_v58 = vadd.f32 %v5406_v45, %v2897_v3  ;;  %v3746_v56 = vpop.f32.mrb[86].mxu0 }
 0x778   : > { %3014 = vst [vmem:[%s5413_s16 + $0x30] sm:$0xff] %v2906_v27  ;;  %v2909_v36 = vadd.f32 %v3746_v56, %v5406_v45  ;;  %v2900_v7 = vpop.f32.mrb[87].mxu0 }
 0x779   : > { %3012 = vst [vmem:[%s5413_s16 + $0x20] sm:$0xff] %v2898_v58  ;;  %v2901_v0 = vadd.f32 %v5406_v45, %v2900_v7 }
 0x77a   : > { %3015 = vst [vmem:[%s5413_s16 + $0x38] sm:$0xff] %v2909_v36 }
 0x77b   : > { %3013 = vst [vmem:[%s5413_s16 + $0x28] sm:$0xff] %v2901_v0 }
 0x77d   : > { %v3749_v17 = vpop.f32.mrb[88].mxu0 }
 0x77e   : > { %v2922_v16 = vadd.f32 %v3749_v17, %v5406_v45  ;;  %v2913_v29 = vpop.f32.mrb[89].mxu0 }
 0x77f   : > { %v2914_v40 = vadd.f32 %v5406_v45, %v2913_v29  ;;  %v3750_v44 = vpop.f32.mrb[90].mxu0 }
 0x780   : > { %3018 = vst [vmem:[%s5413_s16 + $0x50] sm:$0xff] %v2922_v16  ;;  %v2925_v63 = vadd.f32 %v3750_v44, %v5406_v45  ;;  %v2916_v57 = vpop.f32.mrb[91].mxu0 }
 0x781   : > { %3016 = vst [vmem:[%s5413_s16 + $0x40] sm:$0xff] %v2914_v40  ;;  %v2917_v43 = vadd.f32 %v5406_v45, %v2916_v57 }
 0x782   : > { %3019 = vst [vmem:[%s5413_s16 + $0x58] sm:$0xff] %v2925_v63 }
 0x783   : > { %3017 = vst [vmem:[%s5413_s16 + $0x48] sm:$0xff] %v2917_v43 }
 0x789   : > { %v3753_v5 = vpop.f32.mrb[92].mxu0 }
 0x78a   : > { %v2938_v53 = vadd.f32 %v3753_v5, %v5406_v45  ;;  %v2929_v62 = vpop.f32.mrb[93].mxu0 }
 0x78b   : > { %v2930_v31 = vadd.f32 %v5406_v45, %v2929_v62  ;;  %v3754_v9 = vpop.f32.mrb[94].mxu0 }
 0x78c   : > { %3022 = vst [vmem:[%s5413_s16 + $0x70] sm:$0xff] %v2938_v53  ;;  %v2941_v18 = vadd.f32 %v3754_v9, %v5406_v45  ;;  %v2932_v52 = vpop.f32.mrb[95].mxu0 }
 0x78d   : > { %3020 = vst [vmem:[%s5413_s16 + $0x60] sm:$0xff] %v2930_v31  ;;  %v2933_v30 = vadd.f32 %v5406_v45, %v2932_v52 }
 0x78e   : > { %3023 = vst [vmem:[%s5413_s16 + $0x78] sm:$0xff] %v2941_v18 }
 0x78f   : > { %3021 = vst [vmem:[%s5413_s16 + $0x68] sm:$0xff] %v2933_v30 }
 0x7b5   : > { %v3757_v59 = vpop.f32.mrb[96].mxu0 }
 0x7b6   : > { %v2954_v8 = vadd.f32 %v3757_v59, %v5406_v45  ;;  %v2945_v32 = vpop.f32.mrb[97].mxu0 }
 0x7b7   : > { %v2946_v28 = vadd.f32 %v5406_v45, %v2945_v32  ;;  %v3758_v20 = vpop.f32.mrb[98].mxu0 }
 0x7b8   : > { %3026 = vst [vmem:[%s5413_s16 + $0x90] sm:$0xff] %v2954_v8  ;;  %v2957_v4 = vadd.f32 %v3758_v20, %v5406_v45  ;;  %v2948_v39 = vpop.f32.mrb[99].mxu0 }
 0x7b9   : > { %3024 = vst [vmem:[%s5413_s16 + $0x80] sm:$0xff] %v2946_v28  ;;  %v2949_v35 = vadd.f32 %v5406_v45, %v2948_v39 }
 0x7ba   : > { %3027 = vst [vmem:[%s5413_s16 + $0x98] sm:$0xff] %v2957_v4 }
 0x7bb   : > { %3025 = vst [vmem:[%s5413_s16 + $0x88] sm:$0xff] %v2949_v35 }
 0x7e1   : > { %v3761_v22 = vpop.f32.mrb[100].mxu0 }
 0x7e2   : > { %v2970_v2 = vadd.f32 %v3761_v22, %v5406_v45  ;;  %v2961_v60 = vpop.f32.mrb[101].mxu0 }
 0x7e3   : > { %v2962_v24 = vadd.f32 %v5406_v45, %v2961_v60  ;;  %v3762_v15 = vpop.f32.mrb[102].mxu0 }
 0x7e4   : > { %3030 = vst [vmem:[%s5413_s16 + $0xb0] sm:$0xff] %v2970_v2  ;;  %v2973_v1 = vadd.f32 %v3762_v15, %v5406_v45  ;;  %v2964_v6 = vpop.f32.mrb[103].mxu0 }
 0x7e5   : > { %3028 = vst [vmem:[%s5413_s16 + $0xa0] sm:$0xff] %v2962_v24  ;;  %v2965_v21 = vadd.f32 %v5406_v45, %v2964_v6 }
 0x7e6   : > { %3031 = vst [vmem:[%s5413_s16 + $0xb8] sm:$0xff] %v2973_v1 }
 0x7e7   : > { %3029 = vst [vmem:[%s5413_s16 + $0xa8] sm:$0xff] %v2965_v21 }
 0x80d   : > { %v3765_v47 = vpop.f32.mrb[104].mxu0 }
 0x80e   : > { %v2986_v49 = vadd.f32 %v3765_v47, %v5406_v45  ;;  %v2977_v41 = vpop.f32.mrb[105].mxu0 }
 0x80f   : > { %v2978_v14 = vadd.f32 %v5406_v45, %v2977_v41  ;;  %v3766_v55 = vpop.f32.mrb[106].mxu0 }
 0x810   : > { %3034 = vst [vmem:[%s5413_s16 + $0xd0] sm:$0xff] %v2986_v49  ;;  %v2989_v11 = vadd.f32 %v3766_v55, %v5406_v45  ;;  %v2980_v42 = vpop.f32.mrb[107].mxu0 }
 0x811   : > { %3032 = vst [vmem:[%s5413_s16 + $0xc0] sm:$0xff] %v2978_v14  ;;  %v2981_v12 = vadd.f32 %v5406_v45, %v2980_v42 }
 0x812   : > { %3035 = vst [vmem:[%s5413_s16 + $0xd8] sm:$0xff] %v2989_v11 }
 0x813   : > { %3033 = vst [vmem:[%s5413_s16 + $0xc8] sm:$0xff] %v2981_v12 }
 0x839   : > { %v3769_v61 = vpop.f32.mrb[108].mxu0 }
 0x83a   : > { %v3002_v34 = vadd.f32 %v3769_v61, %v5406_v45  ;;  %v2993_v33 = vpop.f32.mrb[109].mxu0 }
 0x83b   : > { %v2994_v54 = vadd.f32 %v5406_v45, %v2993_v33  ;;  %v3770_v46 = vpop.f32.mrb[110].mxu0 }
 0x83c   : > { %3038 = vst [vmem:[%s5413_s16 + $0xf0] sm:$0xff] %v3002_v34  ;;  %v3005_v10 = vadd.f32 %v3770_v46, %v5406_v45  ;;  %v2996_v51 = vpop.f32.mrb[111].mxu0 }
 0x83d   : > { %3036 = vst [vmem:[%s5413_s16 + $0xe0] sm:$0xff] %v2994_v54  ;;  %v2997_v13 = vadd.f32 %v5406_v45, %v2996_v51 }
 0x83e   : > { %3039 = vst [vmem:[%s5413_s16 + $0xf8] sm:$0xff] %v3005_v10 }
 0x83f   : > { %3037 = vst [vmem:[%s5413_s16 + $0xe8] sm:$0xff] %v2997_v13 }
 0x840 PF: > { %s14_s15 = sadd.s32 1, %s4347_s15  }
 0x841   : > { %p11_p4 = scmp.ge.s32.totalorder %s14_s15, 6  }
 0x843   :  { %13 = sbr.rel (!%p11_p4) target bundleno = 1 (0x1), region = 72 }

</bundles_post_ra>
